<compile_context>
chip_gen: v7x
topology: tpu7x:2x2x1
jax: 0.10.0
libtpu: 0.0.40
codegen_flags: <defaults>
</compile_context>

<pallas_src>
import jax
import jax.numpy as jnp
from jax import lax
from jax.experimental import pallas as pl
from jax.experimental.pallas import tpu as pltpu


def mlp_kernel(x_ref, w1_ref, b1_ref, w2_ref, b2_ref, w3_ref, b3_ref, o_ref):
    # x_ref: (tb, in_dim) in native batch-major layout; weights are natural
    # (in, out); biases (1, out) broadcast over the batch (sublane) dim.
    prec = lax.Precision.HIGHEST
    x = x_ref[...]

    h1 = jnp.dot(x, w1_ref[...], preferred_element_type=jnp.float32,
                 precision=prec) + b1_ref[...]
    h1 = jnp.maximum(h1, 0.0)

    h2 = jnp.dot(h1, w2_ref[...], preferred_element_type=jnp.float32,
                 precision=prec) + b2_ref[...]
    h2 = jnp.maximum(h2, 0.0)

    out = jnp.dot(h2, w3_ref[...], preferred_element_type=jnp.float32,
                  precision=prec) + b3_ref[...]
    o_ref[...] = out.astype(o_ref.dtype)


def _round_up(n, m):
    return ((n + m - 1) // m) * m


def _pick_batch_tile(b_pad, max_tile):
    """Largest multiple of 128 that divides b_pad, capped at max_tile, and
    capped so that there are >= 2 grid steps whenever b_pad >= 256 (lets the
    'parallel' batch axis shard across both TensorCores on v7x; costs at most
    one extra ~0.35us grid step on single-TC chips)."""
    n_units = b_pad // 128
    cap = max(1, max_tile // 128)
    if n_units >= 2:
        cap = min(cap, n_units // 2)
    cap = max(cap, 1)
    tile_units = max(d for d in range(1, cap + 1) if n_units % d == 0)
    return tile_units * 128


def navier_stokes_approximator(x, params, *, max_tile=2048):
    """x: (B, input_dim) float32. params: dict of w1,b1,w2,b2,w3,b3 with
    weights stored as (in_features, out_features) and biases (1, out)."""
    w1, b1 = params["w1"], params["b1"]
    w2, b2 = params["w2"], params["b2"]
    w3, b3 = params["w3"], params["b3"]

    B, in_dim = x.shape
    h1_dim, h2_dim = w1.shape[1], w2.shape[1]
    out_dim = w3.shape[1]

    # Pad the batch only up to the next multiple of 128 (lane width).
    b_pad = _round_up(B, 128)
    x_in = x if b_pad == B else jnp.pad(x, ((0, b_pad - B), (0, 0)))

    tb = _pick_batch_tile(b_pad, max_tile)
    n_tiles = b_pad // tb

    pinned = lambda arr: pl.BlockSpec(arr.shape, lambda i: (0, 0))

    flops = 2 * b_pad * (in_dim * h1_dim + h1_dim * h2_dim + h2_dim * out_dim)
    param_bytes = 4 * (in_dim * h1_dim + h1_dim + h1_dim * h2_dim + h2_dim
                       + h2_dim * out_dim + out_dim)
    bytes_accessed = 4 * b_pad * (in_dim + out_dim) + param_bytes

    out = pl.pallas_call(
        mlp_kernel,
        out_shape=jax.ShapeDtypeStruct((b_pad, out_dim), jnp.float32),
        grid=(n_tiles,),
        in_specs=[
            pl.BlockSpec((tb, in_dim), lambda i: (i, 0)),   # x, batch-tiled
            pinned(w1), pinned(b1),
            pinned(w2), pinned(b2),
            pinned(w3), pinned(b3),
        ],
        out_specs=pl.BlockSpec((tb, out_dim), lambda i: (i, 0)),
        compiler_params=pltpu.CompilerParams(
            dimension_semantics=("parallel",)),
        cost_estimate=pl.CostEstimate(
            flops=flops, transcendentals=0, bytes_accessed=bytes_accessed),
    )(x_in, w1, b1, w2, b2, w3, b3)

    # Padded rows carry bias-only garbage; slice them off (no transpose needed).
    return out[:B, :] if b_pad != B else out


def init_params(key, input_dim=6, output_dim=6):
    """Deterministic init mimicking PyTorch nn.Linear default U(-1/sqrt(fan_in), +)."""
    dims = [(input_dim, 128), (128, 64), (64, output_dim)]
    params = {}
    for i, (fan_in, fan_out) in enumerate(dims, start=1):
        key, kw, kb = jax.random.split(key, 3)
        bound = 1.0 / jnp.sqrt(float(fan_in))
        params[f"w{i}"] = jax.random.uniform(
            kw, (fan_in, fan_out), jnp.float32, -bound, bound)
        params[f"b{i}"] = jax.random.uniform(
            kb, (1, fan_out), jnp.float32, -bound, bound)
    return params


def reference_mlp(x, params):
    prec = lax.Precision.HIGHEST
    h1 = jnp.maximum(jnp.dot(x, params["w1"], precision=prec) + params["b1"], 0.0)
    h2 = jnp.maximum(jnp.dot(h1, params["w2"], precision=prec) + params["b2"], 0.0)
    return jnp.dot(h2, params["w3"], precision=prec) + params["b3"]


if __name__ == "__main__":
    key = jax.random.PRNGKey(0)
    k_params, k_x = jax.random.split(key)

    input_dim, output_dim, batch = 6, 6, 8
    params = init_params(k_params, input_dim, output_dim)
    x = jax.random.normal(k_x, (batch, input_dim), jnp.float32)

    out = jax.block_until_ready(navier_stokes_approximator(x, params))
    ref = reference_mlp(x, params)
    assert out.shape == (batch, output_dim)
    assert jnp.allclose(out, ref, atol=1e-5, rtol=1e-5)

    # Batch that spans multiple grid tiles and is not a multiple of 128.
    x_big = jax.random.normal(jax.random.PRNGKey(1), (1000, input_dim), jnp.float32)
    out_big = jax.block_until_ready(
        navier_stokes_approximator(x_big, params, max_tile=256))
    assert out_big.shape == (1000, output_dim)
    assert jnp.allclose(out_big, reference_mlp(x_big, params), atol=1e-5, rtol=1e-5)

    print("KERNEL_OK")
</pallas_src>

<mosaic_0001>
module attributes {stable_mosaic.version = 11 : i64} {
  func.func @mlp_kernel(%arg0: i32, %arg1: memref<128x6xf32, #tpu.memory_space<vmem>>, %arg2: memref<6x128xf32, #tpu.memory_space<vmem>>, %arg3: memref<1x128xf32, #tpu.memory_space<vmem>>, %arg4: memref<128x64xf32, #tpu.memory_space<vmem>>, %arg5: memref<1x64xf32, #tpu.memory_space<vmem>>, %arg6: memref<64x6xf32, #tpu.memory_space<vmem>>, %arg7: memref<1x6xf32, #tpu.memory_space<vmem>>, %arg8: memref<128x6xf32, #tpu.memory_space<vmem>>) attributes {dimension_semantics = [#tpu.dimension_semantics<parallel>], iteration_bounds = array<i64: 1>, scalar_prefetch = 0 : i64, scratch_operands = 0 : i64, tpu.core_type = #tpu.core_type<tc>, window_params = [{transform_indices = @transform_0, window_bounds = array<i64: 128, 6>}, {pipeline_mode = #tpu.pipeline_mode<synchronous>, transform_indices = @transform_1, window_bounds = array<i64: 6, 128>}, {pipeline_mode = #tpu.pipeline_mode<synchronous>, transform_indices = @transform_2, window_bounds = array<i64: 1, 128>}, {pipeline_mode = #tpu.pipeline_mode<synchronous>, transform_indices = @transform_3, window_bounds = array<i64: 128, 64>}, {pipeline_mode = #tpu.pipeline_mode<synchronous>, transform_indices = @transform_4, window_bounds = array<i64: 1, 64>}, {pipeline_mode = #tpu.pipeline_mode<synchronous>, transform_indices = @transform_5, window_bounds = array<i64: 64, 6>}, {pipeline_mode = #tpu.pipeline_mode<synchronous>, transform_indices = @transform_6, window_bounds = array<i64: 1, 6>}, {transform_indices = @transform_7, window_bounds = array<i64: 128, 6>}]} {
    %c0 = arith.constant 0 : index
    %c0_0 = arith.constant 0 : index
    %0 = vector.load %arg1[%c0, %c0_0] : memref<128x6xf32, #tpu.memory_space<vmem>>, vector<128x6xf32>
    %c0_1 = arith.constant 0 : index
    %c0_2 = arith.constant 0 : index
    %1 = vector.load %arg2[%c0_1, %c0_2] : memref<6x128xf32, #tpu.memory_space<vmem>>, vector<6x128xf32>
    %cst = arith.constant dense<0.000000e+00> : vector<128x128xf32>
    %2 = tpu.matmul %0, %1, %cst {dimension_numbers = #tpu.dot_dimension_numbers<[1], [0], [0], [1], [0, 0, 1, 1], [], []>, precision = #tpu.contract_precision<fp32>} : vector<128x6xf32>, vector<6x128xf32>, vector<128x128xf32> -> vector<128x128xf32>
    %c0_3 = arith.constant 0 : index
    %c0_4 = arith.constant 0 : index
    %3 = vector.load %arg3[%c0_3, %c0_4] : memref<1x128xf32, #tpu.memory_space<vmem>>, vector<1x128xf32>
    %4 = vector.broadcast %3 : vector<1x128xf32> to vector<128x128xf32>
    %5 = arith.addf %2, %4 : vector<128x128xf32>
    %cst_5 = arith.constant 0.000000e+00 : f32
    %6 = vector.broadcast %cst_5 : f32 to vector<128x128xf32>
    %7 = arith.maximumf %5, %6 : vector<128x128xf32>
    %c0_6 = arith.constant 0 : index
    %c0_7 = arith.constant 0 : index
    %8 = vector.load %arg4[%c0_6, %c0_7] : memref<128x64xf32, #tpu.memory_space<vmem>>, vector<128x64xf32>
    %cst_8 = arith.constant dense<0.000000e+00> : vector<128x64xf32>
    %9 = tpu.matmul %7, %8, %cst_8 {dimension_numbers = #tpu.dot_dimension_numbers<[1], [0], [0], [1], [0, 0, 1, 1], [], []>, precision = #tpu.contract_precision<fp32>} : vector<128x128xf32>, vector<128x64xf32>, vector<128x64xf32> -> vector<128x64xf32>
    %c0_9 = arith.constant 0 : index
    %c0_10 = arith.constant 0 : index
    %10 = vector.load %arg5[%c0_9, %c0_10] : memref<1x64xf32, #tpu.memory_space<vmem>>, vector<1x64xf32>
    %11 = vector.broadcast %10 : vector<1x64xf32> to vector<128x64xf32>
    %12 = arith.addf %9, %11 : vector<128x64xf32>
    %cst_11 = arith.constant 0.000000e+00 : f32
    %13 = vector.broadcast %cst_11 : f32 to vector<128x64xf32>
    %14 = arith.maximumf %12, %13 : vector<128x64xf32>
    %c0_12 = arith.constant 0 : index
    %c0_13 = arith.constant 0 : index
    %15 = vector.load %arg6[%c0_12, %c0_13] : memref<64x6xf32, #tpu.memory_space<vmem>>, vector<64x6xf32>
    %cst_14 = arith.constant dense<0.000000e+00> : vector<128x6xf32>
    %16 = tpu.matmul %14, %15, %cst_14 {dimension_numbers = #tpu.dot_dimension_numbers<[1], [0], [0], [1], [0, 0, 1, 1], [], []>, precision = #tpu.contract_precision<fp32>} : vector<128x64xf32>, vector<64x6xf32>, vector<128x6xf32> -> vector<128x6xf32>
    %c0_15 = arith.constant 0 : index
    %c0_16 = arith.constant 0 : index
    %17 = vector.load %arg7[%c0_15, %c0_16] : memref<1x6xf32, #tpu.memory_space<vmem>>, vector<1x6xf32>
    %18 = vector.broadcast %17 : vector<1x6xf32> to vector<128x6xf32>
    %19 = arith.addf %16, %18 : vector<128x6xf32>
    %c0_17 = arith.constant 0 : index
    %c0_18 = arith.constant 0 : index
    %20 = vector.load %arg8[%c0_17, %c0_18] : memref<128x6xf32, #tpu.memory_space<vmem>>, vector<128x6xf32>
    tpu.vector_store %arg8[%c0_17, %c0_18], %19 {strides = array<i32>} : memref<128x6xf32, #tpu.memory_space<vmem>>, vector<128x6xf32>,
    return
  }
  func.func @transform_0(%arg0: i32) -> (i32, i32) {
    %c0_i32 = arith.constant 0 : i32
    %c0_i32_0 = arith.constant 0 : i32
    return %arg0, %c0_i32 : i32, i32
  }
  func.func @transform_1(%arg0: i32) -> (i32, i32) {
    %c0_i32 = arith.constant 0 : i32
    %c0_i32_0 = arith.constant 0 : i32
    %c0_i32_1 = arith.constant 0 : i32
    return %c0_i32, %c0_i32_0 : i32, i32
  }
  func.func @transform_2(%arg0: i32) -> (i32, i32) {
    %c0_i32 = arith.constant 0 : i32
    %c0_i32_0 = arith.constant 0 : i32
    %c0_i32_1 = arith.constant 0 : i32
    return %c0_i32, %c0_i32_0 : i32, i32
  }
  func.func @transform_3(%arg0: i32) -> (i32, i32) {
    %c0_i32 = arith.constant 0 : i32
    %c0_i32_0 = arith.constant 0 : i32
    %c0_i32_1 = arith.constant 0 : i32
    return %c0_i32, %c0_i32_0 : i32, i32
  }
  func.func @transform_4(%arg0: i32) -> (i32, i32) {
    %c0_i32 = arith.constant 0 : i32
    %c0_i32_0 = arith.constant 0 : i32
    %c0_i32_1 = arith.constant 0 : i32
    return %c0_i32, %c0_i32_0 : i32, i32
  }
  func.func @transform_5(%arg0: i32) -> (i32, i32) {
    %c0_i32 = arith.constant 0 : i32
    %c0_i32_0 = arith.constant 0 : i32
    %c0_i32_1 = arith.constant 0 : i32
    return %c0_i32, %c0_i32_0 : i32, i32
  }
  func.func @transform_6(%arg0: i32) -> (i32, i32) {
    %c0_i32 = arith.constant 0 : i32
    %c0_i32_0 = arith.constant 0 : i32
    %c0_i32_1 = arith.constant 0 : i32
    return %c0_i32, %c0_i32_0 : i32, i32
  }
  func.func @transform_7(%arg0: i32) -> (i32, i32) {
    %c0_i32 = arith.constant 0 : i32
    %c0_i32_0 = arith.constant 0 : i32
    return %arg0, %c0_i32 : i32, i32
  }
}

</mosaic_0001>

<bundles_post_ra>
// kernel: tpu_custom_call.1
= control target key start
LH: loop header
LB: loop body
LE: loop exit
PB: predicated region body
PF: predicated region fallthrough
CT: control target
= control target key end

     0   :  { %vm99_vm0 = vcmask 1045504   ;;  %vm50_vm1 = vcmask 48128   ;;  %vm2550_vm2 = vcmask 523264   ;;  %s6997_s1 = inlined_call_operand.vmem [shape: f32[6,128], index: 1, kind: input, shape index: {}]   ;;  %s6998_s0 = inlined_call_operand.vmem [shape: f32[128,6], index: 0, kind: input, shape index: {}]   ;;  %s6999_s3 = inlined_call_operand.vmem [shape: f32[128,64], index: 3, kind: input, shape index: {}]   ;;  %s7000_s2 = inlined_call_operand.vmem [shape: f32[1,128], index: 2, kind: input, shape index: {}]   ;;  %s7001_s5 = inlined_call_operand.vmem [shape: f32[64,6], index: 5, kind: input, shape index: {}]   ;;  %s7002_s4 = inlined_call_operand.vmem [shape: f32[1,64], index: 4, kind: input, shape index: {}]   ;;  %s7003_s6 = inlined_call_operand.vmem [shape: f32[1,6], index: 6, kind: input, shape index: {}]   ;;  %s7004_s7 = inlined_call_operand.vmem [shape: f32[128,6], index: 7, kind: output, shape index: {}]  }
   0x1   :  { %v42_v0 = vld [vmem:[%s6997_s1] sm:$0x3f]  ;;  %v27_v2 = vld [vmem:[%s6998_s0 + $0x8] sm:$0xff]  ;;  %v28_v6 = vld [vmem:[%s6998_s0 + $0x10] sm:$0xff] }
   0x2   :  { %v26_v1 = vld [vmem:[%s6998_s0] sm:$0xff]  ;;  %v101_v3 = vsel %vm99_vm0, %v42_v0, 0  ;;  %v55_v5 = vsel %vm50_vm1, %v27_v2, 0  ;;  %v29_v7 = vld [vmem:[%s6998_s0 + $0x18] sm:$0xff]  ;;  %v58_v12 = vsel %vm50_vm1, %v28_v6, 0  ;;  %v31_v13 = vld [vmem:[%s6998_s0 + $0x28] sm:$0xff] }
   0x3   :  { %v52_v4 = vsel %vm50_vm1, %v26_v1, 0  ;;  %v30_v8 = vld [vmem:[%s6998_s0 + $0x20] sm:$0xff]  ;;  %v5610_v9 = vand.u32 4294901760, %v101_v3  ;;  %v5614_v11 = vand.u32 4294901760, %v55_v5  ;;  %v32_v14 = vld [vmem:[%s6998_s0 + $0x30] sm:$0xff]  ;;  %v5623_v15 = vand.u32 4294901760, %v58_v12 }
   0x4   :  { %v5612_v10 = vand.u32 4294901760, %v52_v4  ;;  %v61_v16 = vsel %vm50_vm1, %v29_v7, 0  ;;  %v64_v17 = vsel %vm50_vm1, %v30_v8, 0  ;;  %v67_v18 = vsel %vm50_vm1, %v31_v13, 0  ;;  %v33_v43 = vld [vmem:[%s6998_s0 + $0x38] sm:$0xff]  ;;  %v34_v44 = vld [vmem:[%s6998_s0 + $0x40] sm:$0xff] }
   0x5   :  { %4320 = vmatprep.subr.mxu0 %v5610_v9  ;;  %v5633_v20 = vsub.f32 %v55_v5, %v5614_v11  ;;  %4242 = vmatprep.subr.mxu1 %v5610_v9  ;;  %v5637_v21 = vsub.f32 %v101_v3, %v5610_v9  ;;  %v5639_v22 = vand.u32 4294901760, %v61_v16  ;;  %v5644_v23 = vsub.f32 %v58_v12, %v5623_v15  ;;  %v35_v45 = vld [vmem:[%s6998_s0 + $0x48] sm:$0xff]  ;;  %v36_v54 = vld [vmem:[%s6998_s0 + $0x50] sm:$0xff]  ;;  %v37_v55 = vld [vmem:[%s6998_s0 + $0x58] sm:$0xff] }
   0x6   :  { %v5630_v19 = vsub.f32 %v52_v4, %v5612_v10  ;;  %4321 = vmatpush3.msra.mxu0 %v5610_v9  ;;  %4243 = vmatpush3.msra.mxu1 %v5610_v9  ;;  %v5646_v24 = vand.u32 4294901760, %v64_v17  ;;  %v5648_v25 = vand.u32 4294901760, %v67_v18  ;;  %v70_v26 = vsel %vm50_vm1, %v32_v14, 0  ;;  %v38_v0 = vld [vmem:[%s6998_s0 + $0x60] sm:$0xff]  ;;  %v39_v1 = vld [vmem:[%s6998_s0 + $0x68] sm:$0xff]  ;;  %v40_v13 = vld [vmem:[%s6998_s0 + $0x70] sm:$0xff] }
   0x7   :  { %v181_v28 = vand.u32 4294901760, %v5633_v20  ;;  %v332_v29 = vand.u32 4294901760, %v5637_v21  ;;  %v5655_v30 = vsub.f32 %v61_v16, %v5639_v22  ;;  %v191_v31 = vand.u32 4294901760, %v5644_v23 }
   0x8   :  { %v171_v27 = vand.u32 4294901760, %v5630_v19  ;;  %v5659_v32 = vsub.f32 %v64_v17, %v5646_v24  ;;  %v5662_v33 = vsub.f32 %v67_v18, %v5648_v25  ;;  %v5664_v34 = vand.u32 4294901760, %v70_v26 }
   0x9   :  { %v333_v36 = vsub.f32 %v5637_v21, %v332_v29  ;;  %v182_v37 = vsub.f32 %v5633_v20, %v181_v28  ;;  %v201_v38 = vand.u32 4294901760, %v5655_v30  ;;  %4346 = vmatprep.subr.mxu0 %v332_v29  ;;  %v192_v39 = vsub.f32 %v5644_v23, %v191_v31 }
   0xa   :  { %4322 = vmatprep.mubr.f32.mxu0 %v171_v27  ;;  %v172_v35 = vsub.f32 %v5630_v19, %v171_v27  ;;  %v211_v40 = vand.u32 4294901760, %v5659_v32  ;;  %v221_v41 = vand.u32 4294901760, %v5662_v33  ;;  %v5674_v42 = vsub.f32 %v70_v26, %v5664_v34 }
   0xb   :  { %4323 = vmatmul.mubr.f32.vlgmr.msra.gmra.mrb[0].mxu0 %v181_v28  ;;  %v334_v47 = vand.u32 4294901760, %v333_v36  ;;  %v183_v48 = vand.u32 4294901760, %v182_v37  ;;  %v202_v49 = vsub.f32 %v5655_v30, %v201_v38  ;;  %v193_v50 = vand.u32 4294901760, %v192_v39 }
   0xc   :  { %v173_v46 = vand.u32 4294901760, %v172_v35  ;;  %4325 = vmatprep.mubr.f32.mxu0 %v191_v31  ;;  %4347 = vmatpush3.msra.mxu0 %v332_v29  ;;  %v212_v51 = vsub.f32 %v5659_v32, %v211_v40  ;;  %v231_v52 = vand.u32 4294901760, %v5674_v42  ;;  %v222_v53 = vsub.f32 %v5662_v33, %v221_v41 }
   0xd   :  { %4372 = vmatprep.subr.mxu0 %v5610_v9  ;;  %4268 = vmatprep.subr.mxu1 %v334_v47  ;;  %v203_v56 = vand.u32 4294901760, %v202_v49  ;;  %v73_v57 = vsel %vm50_vm1, %v33_v43, 0  ;;  %v76_v58 = vsel %vm50_vm1, %v34_v44, 0  ;;  %v79_v59 = vsel %vm50_vm1, %v35_v45, 0  ;;  %v41_v44 = vld [vmem:[%s6998_s0 + $0x78] sm:$0xff] }
   0xe   :  { %4244 = vmatprep.mubr.f32.mxu1 %v173_v46  ;;  %v213_v60 = vand.u32 4294901760, %v212_v51  ;;  %v223_v61 = vand.u32 4294901760, %v222_v53  ;;  %v5699_v62 = vand.u32 4294901760, %v73_v57  ;;  %v232_v63 = vsub.f32 %v5674_v42, %v231_v52 }
   0xf   :  { %4245 = vmatmul.mubr.f32.vlgmr.msra.gmra.mrb[0].mxu1 %v183_v48  ;;  %4326 = vmatmul.mubr.f32.gmra.mrb[2].mxu0 %v201_v38  ;;  %v5708_v2 = vand.u32 4294901760, %v76_v58  ;;  %v5710_v3 = vand.u32 4294901760, %v79_v59  ;;  %v82_v4 = vsel %vm50_vm1, %v36_v54, 0  ;;  %v85_v5 = vsel %vm50_vm1, %v37_v55, 0 }
  0x10   :  { %4269 = vmatpush3.msra.mxu1 %v334_v47  ;;  %4247 = vmatprep.mubr.f32.mxu1 %v193_v50  ;;  %v5715_v6 = vsub.f32 %v73_v57, %v5699_v62  ;;  %v233_v7 = vand.u32 4294901760, %v232_v63  ;;  %v5717_v8 = vand.u32 4294901760, %v82_v4  ;;  %v5719_v12 = vand.u32 4294901760, %v85_v5 }
  0x11   :  { %4328 = vmatprep.mubr.f32.mxu0 %v211_v40  ;;  %4294 = vmatprep.subr.mxu1 %v5637_v21  ;;  %v5726_v14 = vsub.f32 %v76_v58, %v5708_v2  ;;  %v5729_v16 = vsub.f32 %v79_v59, %v5710_v3  ;;  %v88_v17 = vsel %vm50_vm1, %v38_v0, 0  ;;  %v91_v18 = vsel %vm50_vm1, %v39_v1, 0 }
  0x12   :  { %v241_v26 = vand.u32 4294901760, %v5715_v6  ;;  %v5735_v27 = vsub.f32 %v82_v4, %v5717_v8  ;;  %v5738_v28 = vsub.f32 %v85_v5, %v5719_v12  ;;  %v5740_v29 = vand.u32 4294901760, %v88_v17 }
  0x13   :  { %4248 = vmatmul.mubr.f32.gmra.mrb[2].mxu1 %v203_v56  ;;  %4329 = vmatmul.mubr.f32.gmra.mrb[4].mxu0 %v221_v41  ;;  %v251_v31 = vand.u32 4294901760, %v5726_v14  ;;  %v261_v35 = vand.u32 4294901760, %v5729_v16  ;;  %v5744_v36 = vand.u32 4294901760, %v91_v18  ;;  %v94_v37 = vsel %vm50_vm1, %v40_v13, 0 }
  0x14   :  { %4250 = vmatprep.mubr.f32.mxu1 %v213_v60  ;;  %4331 = vmatprep.mubr.f32.mxu0 %v231_v52  ;;  %v242_v38 = vsub.f32 %v5715_v6, %v241_v26  ;;  %v271_v39 = vand.u32 4294901760, %v5735_v27  ;;  %v5750_v40 = vsub.f32 %v88_v17, %v5740_v29  ;;  %v5753_v43 = vand.u32 4294901760, %v94_v37 }
  0x15   :  { %v252_v41 = vsub.f32 %v5726_v14, %v251_v31  ;;  %v262_v46 = vsub.f32 %v5729_v16, %v261_v35  ;;  %v281_v47 = vand.u32 4294901760, %v5738_v28  ;;  %v5761_v48 = vsub.f32 %v91_v18, %v5744_v36  ;;  %v5785_v18 = vld [vmem:[%s6999_s3] sm:$0xff] }
  0x16   :  { %v243_v45 = vand.u32 4294901760, %v242_v38  ;;  %v272_v50 = vsub.f32 %v5735_v27, %v271_v39  ;;  %v291_v51 = vand.u32 4294901760, %v5750_v40  ;;  %v5766_v52 = vsub.f32 %v94_v37, %v5753_v43 }
  0x17   :  { %4251 = vmatmul.mubr.f32.gmra.mrb[4].mxu1 %v223_v61  ;;  %4332 = vmatmul.mubr.f32.gmra.mrb[6].mxu0 %v241_v26  ;;  %v253_v49 = vand.u32 4294901760, %v252_v41  ;;  %v97_v53 = vsel %vm50_vm1, %v41_v44, 0  ;;  %v263_v55 = vand.u32 4294901760, %v262_v46  ;;  %v282_v56 = vsub.f32 %v5738_v28, %v281_v47  ;;  %v5790_v26 = vld [vmem:[%s6999_s3 + $0x8] sm:$0xff]  ;;  %v5852_v44 = vld [vmem:[%s6999_s3 + $0x20] sm:$0xff] }
  0x18   :  { %4253 = vmatprep.mubr.f32.mxu1 %v233_v7  ;;  %4334 = vmatprep.mubr.f32.mxu0 %v251_v31  ;;  %v5769_v54 = vand.u32 4294901760, %v97_v53  ;;  %v301_v57 = vand.u32 4294901760, %v5761_v48  ;;  %v273_v58 = vand.u32 4294901760, %v272_v50  ;;  %v292_v59 = vsub.f32 %v5750_v40, %v291_v51 }
  0x19   :  { %v311_v60 = vand.u32 4294901760, %v5766_v52  ;;  %v283_v63 = vand.u32 4294901760, %v282_v56  ;;  %v1237_v37 = vand.u32 4294901760, %v5790_v26 }
  0x1a   :  { %v5776_v61 = vsub.f32 %v97_v53, %v5769_v54  ;;  %v302_v0 = vsub.f32 %v5761_v48, %v301_v57  ;;  %v293_v4 = vand.u32 4294901760, %v292_v59 }
  0x1b   :  { %4254 = vmatmul.mubr.f32.gmra.mrb[6].mxu1 %v243_v45  ;;  %4335 = vmatmul.mubr.f32.gmra.mrb[8].mxu0 %v261_v35  ;;  %v312_v5 = vsub.f32 %v5766_v52, %v311_v60  ;;  %v1234_v35 = vand.u32 4294901760, %v5785_v18  ;;  %v5857_v45 = vld [vmem:[%s6999_s3 + $0x28] sm:$0xff] }
  0x1c   :  { %4256 = vmatprep.mubr.f32.mxu1 %v253_v49  ;;  %4337 = vmatprep.mubr.f32.mxu0 %v271_v39  ;;  %v321_v1 = vand.u32 4294901760, %v5776_v61  ;;  %v303_v7 = vand.u32 4294901760, %v302_v0  ;;  %v1249_v46 = vand.u32 4294901760, %v5857_v45 }
  0x1d   :  { %v313_v17 = vand.u32 4294901760, %v312_v5  ;;  %v5803_v38 = vpack.c.bf16 %v1237_v37, %v1234_v35 }
  0x1e   :  { %v322_v13 = vsub.f32 %v5776_v61, %v321_v1 }
  0x1f   :  { %4257 = vmatmul.mubr.f32.gmra.mrb[8].mxu1 %v263_v55  ;;  %4338 = vmatmul.mubr.f32.gmra.mrb[10].mxu0 %v281_v47 }
  0x20   :  { %4259 = vmatprep.mubr.f32.mxu1 %v273_v58  ;;  %4340 = vmatprep.mubr.f32.mxu0 %v291_v51  ;;  %v323_v31 = vand.u32 4294901760, %v322_v13 }
  0x23   :  { %4260 = vmatmul.mubr.f32.gmra.mrb[10].mxu1 %v283_v63  ;;  %4341 = vmatmul.mubr.f32.gmra.mrb[12].mxu0 %v301_v57 }
  0x24   :  { %4262 = vmatprep.mubr.f32.mxu1 %v293_v4  ;;  %4343 = vmatprep.mubr.f32.mxu0 %v311_v60 }
  0x27   :  { %4263 = vmatmul.mubr.f32.gmra.mrb[12].mxu1 %v303_v7  ;;  %4344 = vmatmul.mubr.f32.gmra.mrb[14].mxu0 %v321_v1 }
  0x28   :  { %4265 = vmatprep.mubr.f32.mxu1 %v313_v17  ;;  %4348 = vmatprep.mubr.f32.mxu0 %v5612_v10 }
  0x2b   :  { %4266 = vmatmul.mubr.f32.gmra.mrb[14].mxu1 %v323_v31  ;;  %4349 = vmatmul.mubr.f32.vlgmr.msra.gmra.mrb[0].mxu0 %v5614_v11 }
  0x2c   :  { %4270 = vmatprep.mubr.f32.mxu1 %v5612_v10  ;;  %4351 = vmatprep.mubr.f32.mxu0 %v5623_v15 }
  0x2d   :  { %4373 = vmatpush3.msra.mxu0 %v5610_v9  ;;  %v5836_v9 = vld [vmem:[%s6999_s3 + $0x10] sm:$0xff] }
  0x2e   :  { %v1240_v39 = vand.u32 4294901760, %v5836_v9 }
  0x2f   :  { %4271 = vmatmul.mubr.f32.vlgmr.msra.gmra.mrb[0].mxu1 %v5614_v11  ;;  %4352 = vmatmul.mubr.f32.gmra.mrb[2].mxu0 %v5639_v22 }
  0x30   :  { %4295 = vmatpush3.msra.mxu1 %v5637_v21  ;;  %4273 = vmatprep.mubr.f32.mxu1 %v5623_v15  ;;  %v5841_v21 = vld [vmem:[%s6999_s3 + $0x18] sm:$0xff] }
  0x31   :  { %4354 = vmatprep.mubr.f32.mxu0 %v5646_v24  ;;  %4975 = vmatprep.subr.bf16.mxu1 %v5803_v38  ;;  %v1243_v41 = vand.u32 4294901760, %v5841_v21 }
  0x33   :  { %4274 = vmatmul.mubr.f32.gmra.mrb[2].mxu1 %v5639_v22  ;;  %4355 = vmatmul.mubr.f32.gmra.mrb[4].mxu0 %v5648_v25 }
  0x34   :  { %4276 = vmatprep.mubr.f32.mxu1 %v5646_v24  ;;  %4357 = vmatprep.mubr.f32.mxu0 %v5664_v34 }
  0x37   :  { %4277 = vmatmul.mubr.f32.gmra.mrb[4].mxu1 %v5648_v25  ;;  %4358 = vmatmul.mubr.f32.gmra.mrb[6].mxu0 %v5699_v62 }
  0x38   :  { %4279 = vmatprep.mubr.f32.mxu1 %v5664_v34  ;;  %4360 = vmatprep.mubr.f32.mxu0 %v5708_v2 }
  0x3b   :  { %4280 = vmatmul.mubr.f32.gmra.mrb[6].mxu1 %v5699_v62  ;;  %4361 = vmatmul.mubr.f32.gmra.mrb[8].mxu0 %v5710_v3 }
  0x3c   :  { %4282 = vmatprep.mubr.f32.mxu1 %v5708_v2  ;;  %4363 = vmatprep.mubr.f32.mxu0 %v5717_v8 }
  0x3f   :  { %4283 = vmatmul.mubr.f32.gmra.mrb[8].mxu1 %v5710_v3  ;;  %4364 = vmatmul.mubr.f32.gmra.mrb[10].mxu0 %v5719_v12 }
  0x40   :  { %4285 = vmatprep.mubr.f32.mxu1 %v5717_v8  ;;  %4366 = vmatprep.mubr.f32.mxu0 %v5740_v29 }
  0x43   :  { %4286 = vmatmul.mubr.f32.gmra.mrb[10].mxu1 %v5719_v12  ;;  %4367 = vmatmul.mubr.f32.gmra.mrb[12].mxu0 %v5744_v36 }
  0x44   :  { %4288 = vmatprep.mubr.f32.mxu1 %v5740_v29  ;;  %4369 = vmatprep.mubr.f32.mxu0 %v5753_v43 }
  0x47   :  { %4289 = vmatmul.mubr.f32.gmra.mrb[12].mxu1 %v5744_v36  ;;  %4370 = vmatmul.mubr.f32.gmra.mrb[14].mxu0 %v5769_v54 }
  0x48   :  { %4291 = vmatprep.mubr.f32.mxu1 %v5753_v43  ;;  %4374 = vmatprep.mubr.f32.mxu0 %v5612_v10  ;;  %v5865_v10 = vpack.c.bf16 %v1243_v41, %v1240_v39 }
  0x4b   :  { %4292 = vmatmul.mubr.f32.gmra.mrb[14].mxu1 %v5769_v54  ;;  %4375 = vmatmul.mubr.f32.vlgmr.msra.gmra.mrb[0].mxu0 %v5614_v11  ;;  %v1246_v11 = vand.u32 4294901760, %v5852_v44 }
  0x4c   :  { %4296 = vmatprep.mubr.f32.mxu1 %v5630_v19  ;;  %4377 = vmatprep.mubr.f32.mxu0 %v5623_v15  ;;  %v1216_v19 = vld [vmem:[%s6999_s3 + $0x30] sm:$0xff] }
  0x4d   :  { %v5879_v15 = vpack.c.bf16 %v1249_v46, %v1246_v11 }
  0x4f   :  { %4297 = vmatmul.mubr.f32.vlgmr.msra.gmra.mrb[0].mxu1 %v5633_v20  ;;  %4378 = vmatmul.mubr.f32.gmra.mrb[2].mxu0 %v5639_v22  ;;  %v1217_v20 = vld [vmem:[%s6999_s3 + $0x38] sm:$0xff]  ;;  %v1252_v22 = vand.u32 4294901760, %v1216_v19 }
  0x50   :  { %4299 = vmatprep.mubr.f32.mxu1 %v5644_v23  ;;  %4380 = vmatprep.mubr.f32.mxu0 %v5646_v24  ;;  %v1255_v23 = vand.u32 4294901760, %v1217_v20 }
  0x51   :  { %4977 = vmatpush3.bf16.msra.mxu1 %v5803_v38  ;;  %v5979_v56 = vsub.f32 %v1216_v19, %v1252_v22 }
  0x52   :  { %4979 = vmatprep.subr.bf16.mxu1 %v5865_v10  ;;  %v5914_v24 = vpack.c.bf16 %v1255_v23, %v1252_v22  ;;  %v5981_v57 = vsub.f32 %v1217_v20, %v1255_v23 }
  0x53   :  { %4300 = vmatmul.mubr.f32.gmra.mrb[2].mxu1 %v5655_v30  ;;  %4381 = vmatmul.mubr.f32.gmra.mrb[4].mxu0 %v5648_v25  ;;  %v1218_v25 = vld [vmem:[%s6999_s3 + $0x40] sm:$0xff]  ;;  %v1219_v30 = vld [vmem:[%s6999_s3 + $0x48] sm:$0xff]  ;;  %7079 = vst [vmem:[#allocation8_spill] sm:$0xff] %v5979_v56  ;;  %v7014_v58 = vand.u32 4294901760, %v5979_v56 }
  0x54   :  { %4302 = vmatprep.mubr.f32.mxu1 %v5659_v32  ;;  %4383 = vmatprep.mubr.f32.mxu0 %v5664_v34  ;;  %v1258_v32 = vand.u32 4294901760, %v1218_v25  ;;  %7080 = vst [vmem:[#allocation9_spill] sm:$0xff] %v5981_v57  ;;  %v7013_v59 = vand.u32 4294901760, %v5981_v57 }
  0x55   :  { %4981 = vmatpush3.bf16.msra.mxu1 %v5865_v10  ;;  %v1520_v60 = vsub.f32 %v5979_v56, %v7014_v58 }
  0x56   :  { %4983 = vmatprep.subr.bf16.mxu1 %v5879_v15  ;;  %v5991_v63 = vsub.f32 %v1218_v25, %v1258_v32 }
  0x57   :  { %4303 = vmatmul.mubr.f32.gmra.mrb[4].mxu1 %v5662_v33  ;;  %4384 = vmatmul.mubr.f32.gmra.mrb[6].mxu0 %v5699_v62  ;;  %v1261_v33 = vand.u32 4294901760, %v1219_v30  ;;  %v1221_v62 = vld [vmem:[%s6999_s3 + $0x58] sm:$0xff]  ;;  %v1521_v1 = vand.u32 4294901760, %v1520_v60 }
  0x58   :  { %4305 = vmatprep.mubr.f32.mxu1 %v5674_v42  ;;  %4386 = vmatprep.mubr.f32.mxu0 %v5708_v2  ;;  %v1220_v42 = vld [vmem:[%s6999_s3 + $0x50] sm:$0xff]  ;;  %7081 = vst [vmem:[#allocation10_spill] sm:$0xff] %v5991_v63  ;;  %v7012_v5 = vand.u32 4294901760, %v5991_v63 }
  0x59   :  { %4985 = vmatpush3.bf16.msra.mxu1 %v5879_v15  ;;  %v5924_v34 = vpack.c.bf16 %v1261_v33, %v1258_v32  ;;  %v1264_v2 = vand.u32 4294901760, %v1220_v42  ;;  %v5993_v0 = vsub.f32 %v1219_v30, %v1261_v33 }
  0x5a   :  { %4987 = vmatprep.subr.bf16.mxu1 %v5914_v24  ;;  %v1534_v17 = vsub.f32 %v5991_v63, %v7012_v5 }
  0x5b   :  { %4306 = vmatmul.mubr.f32.gmra.mrb[6].mxu1 %v5715_v6  ;;  %4387 = vmatmul.mubr.f32.gmra.mrb[8].mxu0 %v5710_v3  ;;  %7073 = vst [vmem:[#allocation2_spill] sm:$0xff] %v5924_v34  ;;  %v1267_v3 = vand.u32 4294901760, %v1221_v62  ;;  %7082 = vst [vmem:[#allocation11_spill] sm:$0xff] %v5993_v0  ;;  %v7011_v7 = vand.u32 4294901760, %v5993_v0 }
  0x5c   :  { %4308 = vmatprep.mubr.f32.mxu1 %v5726_v14  ;;  %4389 = vmatprep.mubr.f32.mxu0 %v5717_v8  ;;  %v1222_v8 = vld [vmem:[%s6999_s3 + $0x60] sm:$0xff] }
  0x5d   :  { %4989 = vmatpush3.bf16.msra.mxu1 %v5914_v24  ;;  %v5934_v6 = vpack.c.bf16 %v1267_v3, %v1264_v2  ;;  %v1270_v14 = vand.u32 4294901760, %v1222_v8  ;;  %v1541_v31 = vsub.f32 %v5993_v0, %v7011_v7 }
  0x5e   :  { %4991 = vmatprep.subr.bf16.mxu1 %v5924_v34 }
  0x5f   :  { %4309 = vmatmul.mubr.f32.gmra.mrb[8].mxu1 %v5729_v16  ;;  %4390 = vmatmul.mubr.f32.gmra.mrb[10].mxu0 %v5719_v12  ;;  %7074 = vst [vmem:[#allocation3_spill] sm:$0xff] %v5934_v6  ;;  %v1223_v12 = vld [vmem:[%s6999_s3 + $0x68] sm:$0xff]  ;;  %v1542_v20 = vand.u32 4294901760, %v1541_v31  ;;  %v6017_v25 = vsub.f32 %v1222_v8, %v1270_v14 }
  0x60   :  { %4311 = vmatprep.mubr.f32.mxu1 %v5735_v27  ;;  %4392 = vmatprep.mubr.f32.mxu0 %v5740_v29  ;;  %v1273_v16 = vand.u32 4294901760, %v1223_v12  ;;  %v5954_v29 = vsub.f32 %v5790_v26, %v1237_v37  ;;  %v6004_v26 = vsub.f32 %v1221_v62, %v1267_v3 }
  0x61   :  { %4993 = vmatpush3.bf16.msra.mxu1 %v5924_v34  ;;  %7085 = vst [vmem:[#allocation14_spill] sm:$0xff] %v6017_v25  ;;  %v7008_v62 = vand.u32 4294901760, %v6017_v25 }
  0x62   :  { %4995 = vmatprep.subr.bf16.mxu1 %v5934_v6  ;;  %v5944_v27 = vpack.c.bf16 %v1273_v16, %v1270_v14  ;;  %7077 = vst [vmem:[#allocation6_spill] sm:$0xff] %v5954_v29  ;;  %v7018_v49 = vand.u32 4294901760, %v5954_v29  ;;  %7084 = vst [vmem:[#allocation13_spill] sm:$0xff] %v6004_v26  ;;  %v7009_v19 = vand.u32 4294901760, %v6004_v26  ;;  %v6019_v30 = vsub.f32 %v1223_v12, %v1273_v16 }
  0x63   :  { %4312 = vmatmul.mubr.f32.gmra.mrb[10].mxu1 %v5738_v28  ;;  %4393 = vmatmul.mubr.f32.gmra.mrb[12].mxu0 %v5744_v36  ;;  %v5949_v28 = vsub.f32 %v5785_v18, %v1234_v35  ;;  %v1224_v36 = vld [vmem:[%s6999_s3 + $0x70] sm:$0xff]  ;;  %v6002_v18 = vsub.f32 %v1220_v42, %v1264_v2  ;;  %v1535_v35 = vand.u32 4294901760, %v1534_v17  ;;  %v6059_v17 = vpack.c.bf16 %v5993_v0, %v5991_v63 }
  0x64   :  { %4314 = vmatprep.mubr.f32.mxu1 %v5750_v40  ;;  %4395 = vmatprep.mubr.f32.mxu0 %v5753_v43  ;;  %7075 = vst [vmem:[#allocation4_spill] sm:$0xff] %v5944_v27  ;;  %v1225_v40 = vld [vmem:[%s6999_s3 + $0x78] sm:$0xff]  ;;  %v1276_v43 = vand.u32 4294901760, %v1224_v36  ;;  %v1555_v23 = vsub.f32 %v6004_v26, %v7009_v19  ;;  %7086 = vst [vmem:[#allocation15_spill] sm:$0xff] %v6019_v30  ;;  %v7007_v2 = vand.u32 4294901760, %v6019_v30 }
  0x65   :  { %4997 = vmatpush3.bf16.msra.mxu1 %v5934_v6  ;;  %7076 = vst [vmem:[#allocation5_spill] sm:$0xff] %v5949_v28  ;;  %v1279_v47 = vand.u32 4294901760, %v1225_v40  ;;  %7083 = vst [vmem:[#allocation12_spill] sm:$0xff] %v6002_v18  ;;  %v7010_v37 = vand.u32 4294901760, %v6002_v18  ;;  %v6021_v32 = vpack.c.bf16 %v1542_v20, %v1535_v35  ;;  %v6063_v31 = vpack.c.bf16 %v6004_v26, %v6002_v18 }
  0x66   :  { %4999 = vmatprep.subr.bf16.mxu1 %v5944_v27  ;;  %v1556_v42 = vand.u32 4294901760, %v1555_v23  ;;  %v1569_v8 = vsub.f32 %v6019_v30, %v7007_v2  ;;  %v6033_v12 = vsub.f32 %v1224_v36, %v1276_v43  ;;  %v6067_v35 = vpack.c.bf16 %v6019_v30, %v6017_v25 }
  0x67   :  { %4315 = vmatmul.mubr.f32.gmra.mrb[12].mxu1 %v5761_v48  ;;  %4396 = vmatmul.mubr.f32.gmra.mrb[14].mxu0 %v5769_v54  ;;  %v7020_v48 = vand.u32 4294901760, %v5949_v28  ;;  %v5966_v50 = vpack.c.bf16 %v1279_v47, %v1276_v43  ;;  %v1548_v22 = vsub.f32 %v6002_v18, %v7010_v37  ;;  %v6035_v14 = vsub.f32 %v1225_v40, %v1279_v47 }
  0x68   :  { %4317 = vmatprep.mubr.f32.mxu1 %v5766_v52  ;;  %v1485_v52 = vsub.f32 %v5954_v29, %v7018_v49  ;;  %7087 = vst [vmem:[#allocation16_spill] sm:$0xff] %v6033_v12  ;;  %v6051_v47 = vpack.c.bf16 %v5954_v29, %v5949_v28  ;;  %v6081_v23 = vsub.f32 %v5841_v21, %v1243_v41 }
  0x69   :  { %5001 = vmatpush3.bf16.msra.mxu1 %v5944_v27  ;;  %7078 = vst [vmem:[#allocation7_spill] sm:$0xff] %v5966_v50  ;;  %v1478_v51 = vsub.f32 %v5949_v28, %v7020_v48  ;;  %v1549_v33 = vand.u32 4294901760, %v1548_v22  ;;  %7088 = vst [vmem:[#allocation17_spill] sm:$0xff] %v6035_v14  ;;  %v6071_v20 = vpack.c.bf16 %v6035_v14, %v6033_v12 }
  0x6a   :  { %5003 = vmatprep.subr.bf16.mxu1 %v5966_v50  ;;  %v1486_v54 = vand.u32 4294901760, %v1485_v52  ;;  %v1570_v52 = vand.u32 4294901760, %v1569_v8  ;;  %v6076_v22 = vsub.f32 %v5836_v9, %v1240_v39  ;;  %v6096_v9 = vld [vmem:[%s7000_s2] ss:$0 sm:$0xff]  ;;  %v7016_v39 = vand.u32 4294901760, %v6081_v23 }
  0x6b   :  { %4318 = vmatmul.mubr.f32.gmra.mrb[14].mxu1 %v5776_v61  ;;  %v1479_v53 = vand.u32 4294901760, %v1478_v51  ;;  %v1527_v61 = vsub.f32 %v5981_v57, %v7013_v59  ;;  %v6025_v3 = vpack.c.bf16 %v1556_v42, %v1549_v33  ;;  %v1562_v51 = vsub.f32 %v6017_v25, %v7008_v62 }
  0x6c   :  { %v6086_v42 = vsub.f32 %v5852_v44, %v1246_v11  ;;  %v7017_v21 = vand.u32 4294901760, %v6076_v22 }
  0x6d   :  { %5005 = vmatpush3.bf16.msra.mxu1 %v5966_v50  ;;  %v5976_v55 = vpack.c.bf16 %v1486_v54, %v1479_v53  ;;  %v1528_v4 = vand.u32 4294901760, %v1527_v61  ;;  %v1563_v16 = vand.u32 4294901760, %v1562_v51  ;;  %v7006_v53 = vand.u32 4294901760, %v6033_v12 }
  0x6e   :  { %v7005_v54 = vand.u32 4294901760, %v6035_v14  ;;  %v6091_v51 = vsub.f32 %v5857_v45, %v1249_v46  ;;  %v7015_v44 = vand.u32 4294901760, %v6086_v42 }
  0x6f   :  { %5007 = vmatprep.subr.bf16.mxu1 %v5976_v55  ;;  %v5997_v13 = vpack.c.bf16 %v1528_v4, %v1521_v1  ;;  %v6039_v60 = vpack.c.bf16 %v1570_v52, %v1563_v16  ;;  %v1576_v61 = vsub.f32 %v6033_v12, %v7006_v53  ;;  %v6055_v4 = vpack.c.bf16 %v5981_v57, %v5979_v56 }
  0x70   :  { %v1583_v1 = vsub.f32 %v6035_v14, %v7005_v54  ;;  %v7019_v11 = vand.u32 4294901760, %v6091_v51 }
  0x71   :  { %v1577_v36 = vand.u32 4294901760, %v1576_v61 }
  0x72   :  { %v1584_v43 = vand.u32 4294901760, %v1583_v1 }
  0x74   :  { %v6047_v40 = vpack.c.bf16 %v1584_v43, %v1577_v36  ;;  %v1492_v36 = vsub.f32 %v6076_v22, %v7017_v21  ;;  %v1499_v43 = vsub.f32 %v6081_v23, %v7016_v39 }
  0x76   :  { %v1500_v59 = vand.u32 4294901760, %v1499_v43 }
 0x11e   :  { %v4376_v33 = vpop.f32.mrb[0].mxu0 }
 0x11f   :  { %v1100_v8 = vpop.f32.mrb[1].mxu0 }
 0x122   :  { %v4298_v41 = vpop.f32.mrb[0].mxu1  ;;  %v4379_v16 = vpop.f32.mrb[2].mxu0 }
 0x123   :  { %v5262_v52 = vadd.f32 %v4298_v41, %v6096_v9  ;;  %v565_v45 = vpop.f32.mrb[1].mxu1  ;;  %v1112_v46 = vpop.f32.mrb[3].mxu0  ;;  %v1506_v41 = vsub.f32 %v6086_v42, %v7015_v44 }
 0x124   :  { %v5264_v61 = vadd.f32 %v6096_v9, %v565_v45  ;;  %v1513_v45 = vsub.f32 %v6091_v51, %v7019_v11 }
 0x125   :  { %v5263_v1 = vadd.f32 %v5262_v52, %v4376_v33  ;;  %v1507_v49 = vand.u32 4294901760, %v1506_v41 }
 0x126   :  { %v5265_v54 = vadd.f32 %v5264_v61, %v1100_v8  ;;  %v4301_v53 = vpop.f32.mrb[2].mxu1  ;;  %v4382_v2 = vpop.f32.mrb[4].mxu0  ;;  %v1493_v61 = vand.u32 4294901760, %v1492_v36  ;;  %v1514_v11 = vand.u32 4294901760, %v1513_v45 }
 0x127   :  { %v1195_v33 = vmax.f32 %v5263_v1, 0.0  ;;  %v5266_v52 = vadd.f32 %v4301_v53, %v6096_v9  ;;  %v579_v62 = vpop.f32.mrb[3].mxu1  ;;  %v1124_v19 = vpop.f32.mrb[5].mxu0 }
 0x128   :  { %v1194_v37 = vmax.f32 %v5265_v54, 0.0  ;;  %v5268_v7 = vadd.f32 %v6096_v9, %v579_v62  ;;  %v6133_v41 = vpack.c.bf16 %v1500_v59, %v1493_v61  ;;  %v6138_v12 = vpack.c.bf16 %v1514_v11, %v1507_v49 }
 0x129   :  { %v6118_v5 = vand.u32 4294901760, %v1195_v33  ;;  %v5267_v8 = vadd.f32 %v5266_v52, %v4379_v16 }
 0x12a   :  { %v6120_v58 = vand.u32 4294901760, %v1194_v37  ;;  %v5269_v44 = vadd.f32 %v5268_v7, %v1112_v46  ;;  %v4304_v39 = vpop.f32.mrb[4].mxu1  ;;  %v4385_v21 = vpop.f32.mrb[6].mxu0 }
 0x12b   :  { %v6123_v1 = vsub.f32 %v1195_v33, %v6118_v5  ;;  %v1197_v53 = vmax.f32 %v5267_v8, 0.0  ;;  %v5270_v54 = vadd.f32 %v4304_v39, %v6096_v9  ;;  %v593_v48 = vpop.f32.mrb[5].mxu1  ;;  %v1136_v62 = vpop.f32.mrb[7].mxu0 }
 0x12c   :  { %v6127_v14 = vsub.f32 %v1194_v37, %v6120_v58  ;;  %v1196_v16 = vmax.f32 %v5269_v44, 0.0  ;;  %v5272_v36 = vadd.f32 %v6096_v9, %v593_v48 }
 0x12d   :  { %v7023_v7 = vand.u32 4294901760, %v6123_v1  ;;  %v6131_v46 = vand.u32 4294901760, %v1197_v53  ;;  %v5271_v43 = vadd.f32 %v5270_v54, %v4382_v2 }
 0x12e   :  { %v6135_v45 = vand.u32 4294901760, %v1196_v16  ;;  %v5273_v33 = vadd.f32 %v5272_v36, %v1124_v19  ;;  %v4307_v52 = vpop.f32.mrb[6].mxu1  ;;  %v4388_v39 = vpop.f32.mrb[8].mxu0  ;;  %v7028_v8 = vand.u32 4294901760, %v6127_v14 }
 0x12f   :  { %v1327_v48 = vsub.f32 %v6123_v1, %v7023_v7  ;;  %v6144_v37 = vsub.f32 %v1197_v53, %v6131_v46  ;;  %v1199_v44 = vmax.f32 %v5271_v43, 0.0  ;;  %v5274_v59 = vadd.f32 %v4307_v52, %v6096_v9  ;;  %v607_v2 = vpop.f32.mrb[7].mxu1  ;;  %v1148_v61 = vpop.f32.mrb[9].mxu0 }
 0x130   :  { %v6148_v19 = vsub.f32 %v1196_v16, %v6135_v45  ;;  %v1198_v54 = vmax.f32 %v5273_v33, 0.0  ;;  %v5276_v36 = vadd.f32 %v6096_v9, %v607_v2  ;;  %v1317_v49 = vsub.f32 %v6127_v14, %v7028_v8 }
 0x131   :  { %v1328_v11 = vand.u32 4294901760, %v1327_v48  ;;  %v6154_v7 = vand.u32 4294901760, %v1199_v44  ;;  %v5275_v53 = vadd.f32 %v5274_v59, %v4385_v21  ;;  %v7032_v43 = vand.u32 4294901760, %v6144_v37 }
 0x132   :  { %v6157_v30 = vand.u32 4294901760, %v1198_v54  ;;  %v5277_v52 = vadd.f32 %v5276_v36, %v1136_v62  ;;  %v4310_v25 = vpop.f32.mrb[8].mxu1  ;;  %v4391_v26 = vpop.f32.mrb[10].mxu0  ;;  %v1318_v16 = vand.u32 4294901760, %v1317_v49  ;;  %v7034_v33 = vand.u32 4294901760, %v6148_v19 }
 0x133   :  { %v6161_v2 = vsub.f32 %v1199_v44, %v6154_v7  ;;  %v1201_v18 = vmax.f32 %v5275_v53, 0.0  ;;  %v5278_v8 = vadd.f32 %v4310_v25, %v6096_v9  ;;  %v621_v48 = vpop.f32.mrb[9].mxu1  ;;  %v1160_v0 = vpop.f32.mrb[11].mxu0  ;;  %v1347_v21 = vsub.f32 %v6144_v37, %v7032_v43 }
 0x134   :  { %v6168_v59 = vsub.f32 %v1198_v54, %v6157_v30  ;;  %v1200_v62 = vmax.f32 %v5277_v52, 0.0  ;;  %v5280_v36 = vadd.f32 %v6096_v9, %v621_v48  ;;  %4430 = vmatprep.mubr.f32.mxu1 %v1318_v16  ;;  %v1337_v44 = vsub.f32 %v6148_v19, %v7034_v33 }
 0x135   :  { %v6174_v49 = vand.u32 4294901760, %v1201_v18  ;;  %v5279_v25 = vadd.f32 %v5278_v8, %v4388_v39  ;;  %4431 = vmatmul.mubr.f32.vlgmr.msra.gmra.mrb[16].mxu1 %v1328_v11  ;;  %v1348_v53 = vand.u32 4294901760, %v1347_v21  ;;  %v7037_v63 = vand.u32 4294901760, %v6161_v2 }
 0x136   :  { %v6177_v57 = vand.u32 4294901760, %v1200_v62  ;;  %v5281_v43 = vadd.f32 %v5280_v36, %v1148_v61  ;;  %5009 = vmatpush3.bf16.msra.mxu1 %v5976_v55  ;;  %v4313_v54 = vpop.f32.mrb[10].mxu1  ;;  %v4394_v52 = vpop.f32.mrb[12].mxu0  ;;  %v1338_v48 = vand.u32 4294901760, %v1337_v44  ;;  %v7040_v16 = vand.u32 4294901760, %v6168_v59 }
 0x137   :  { %v6182_v56 = vsub.f32 %v1201_v18, %v6174_v49  ;;  %v1203_v33 = vmax.f32 %v5279_v25, 0.0  ;;  %v5282_v39 = vadd.f32 %v4313_v54, %v6096_v9  ;;  %v635_v8 = vpop.f32.mrb[11].mxu1  ;;  %v1172_v11 = vpop.f32.mrb[13].mxu0  ;;  %5011 = vmatprep.subr.bf16.mxu1 %v6133_v41  ;;  %v1367_v61 = vsub.f32 %v6161_v2, %v7037_v63 }
 0x138   :  { %v6190_v55 = vsub.f32 %v1200_v62, %v6177_v57  ;;  %v1202_v21 = vmax.f32 %v5281_v43, 0.0  ;;  %v5284_v36 = vadd.f32 %v6096_v9, %v635_v8  ;;  %4433 = vmatprep.mubr.f32.mxu1 %v1338_v48  ;;  %v1357_v18 = vsub.f32 %v6168_v59, %v7040_v16 }
 0x139   :  { %v6196_v44 = vand.u32 4294901760, %v1203_v33  ;;  %v5283_v25 = vadd.f32 %v5282_v39, %v4391_v26  ;;  %4434 = vmatmul.mubr.f32.gmra.mrb[18].mxu1 %v1348_v53  ;;  %v1368_v54 = vand.u32 4294901760, %v1367_v61  ;;  %v7045_v29 = vand.u32 4294901760, %v6182_v56 }
 0x13a   :  { %v6199_v28 = vand.u32 4294901760, %v1202_v21  ;;  %v5285_v63 = vadd.f32 %v5284_v36, %v1160_v0  ;;  %5013 = vmatpush3.bf16.msra.mxu1 %v6133_v41  ;;  %v4316_v43 = vpop.f32.mrb[12].mxu1  ;;  %v4397_v62 = vpop.f32.mrb[14].mxu0  ;;  %v1358_v8 = vand.u32 4294901760, %v1357_v18  ;;  %v7046_v48 = vand.u32 4294901760, %v6190_v55 }
 0x13b   :  { %v6204_v50 = vsub.f32 %v1203_v33, %v6196_v44  ;;  %v1205_v16 = vmax.f32 %v5283_v25, 0.0  ;;  %v5286_v26 = vadd.f32 %v4316_v43, %v6096_v9  ;;  %v649_v53 = vpop.f32.mrb[13].mxu1  ;;  %v1184_v39 = vpop.f32.mrb[15].mxu0  ;;  %5015 = vmatprep.subr.bf16.mxu1 %v6138_v12  ;;  %v1387_v0 = vsub.f32 %v6182_v56, %v7045_v29 }
 0x13c   :  { %v6212_v41 = vsub.f32 %v1202_v21, %v6199_v28  ;;  %v1204_v61 = vmax.f32 %v5285_v63, 0.0  ;;  %v5288_v36 = vadd.f32 %v6096_v9, %v649_v53  ;;  %4436 = vmatprep.mubr.f32.mxu1 %v1358_v8  ;;  %v1377_v33 = vsub.f32 %v6190_v55, %v7046_v48 }
 0x13d   :  { %v6218_v18 = vand.u32 4294901760, %v1205_v16  ;;  %v5287_v25 = vadd.f32 %v5286_v26, %v4394_v52  ;;  %4437 = vmatmul.mubr.f32.gmra.mrb[20].mxu1 %v1368_v54  ;;  %v1388_v43 = vand.u32 4294901760, %v1387_v0  ;;  %v1406_v27 = vand.u32 4294901760, %v6204_v50 }
 0x13e   :  { %v6221_v6 = vand.u32 4294901760, %v1204_v61  ;;  %v5289_v29 = vadd.f32 %v5288_v36, %v1172_v11  ;;  %5017 = vmatpush3.bf16.msra.mxu1 %v6138_v12  ;;  %v4319_v63 = vpop.f32.mrb[14].mxu1  ;;  %v1378_v21 = vand.u32 4294901760, %v1377_v33  ;;  %v1396_v8 = vand.u32 4294901760, %v6212_v41 }
 0x13f   :  { %v6226_v53 = vsub.f32 %v1205_v16, %v6218_v18  ;;  %v1207_v48 = vmax.f32 %v5287_v25, 0.0  ;;  %v5290_v34 = vadd.f32 %v4319_v63, %v6096_v9  ;;  %v663_v52 = vpop.f32.mrb[15].mxu1  ;;  %5019 = vmatprep.subr.bf16.mxu1 %v5997_v13  ;;  %v1407_v54 = vsub.f32 %v6204_v50, %v1406_v27 }
 0x140   :  { %v6234_v11 = vsub.f32 %v1204_v61, %v6221_v6  ;;  %v1206_v12 = vmax.f32 %v5289_v29, 0.0  ;;  %v5292_v26 = vadd.f32 %v6096_v9, %v663_v52  ;;  %4439 = vmatprep.mubr.f32.mxu1 %v1378_v21  ;;  %v1397_v16 = vsub.f32 %v6212_v41, %v1396_v8 }
 0x141   :  { %v6240_v0 = vand.u32 4294901760, %v1207_v48  ;;  %v5291_v36 = vadd.f32 %v5290_v34, %v4397_v62  ;;  %4440 = vmatmul.mubr.f32.gmra.mrb[22].mxu1 %v1388_v43  ;;  %v1426_v33 = vand.u32 4294901760, %v6226_v53  ;;  %v1408_v52 = vand.u32 4294901760, %v1407_v54 }
 0x142   :  { %v6243_v25 = vand.u32 4294901760, %v1206_v12  ;;  %v5293_v63 = vadd.f32 %v5292_v26, %v1184_v39  ;;  %5021 = vmatpush3.bf16.msra.mxu1 %v5997_v13  ;;  %v1398_v61 = vand.u32 4294901760, %v1397_v16  ;;  %v1416_v29 = vand.u32 4294901760, %v6234_v11 }
 0x143   :  { %v6248_v9 = vsub.f32 %v1207_v48, %v6240_v0  ;;  %v1209_v21 = vmax.f32 %v5291_v36, 0.0  ;;  %5023 = vmatprep.subr.bf16.mxu1 %v6021_v32  ;;  %v1427_v34 = vsub.f32 %v6226_v53, %v1426_v33 }
 0x144   :  { %v6255_v62 = vsub.f32 %v1206_v12, %v6243_v25  ;;  %v1208_v39 = vmax.f32 %v5293_v63, 0.0  ;;  %4442 = vmatprep.mubr.f32.mxu1 %v1398_v61  ;;  %v1417_v13 = vsub.f32 %v6234_v11, %v1416_v29 }
 0x145   :  { %v6260_v43 = vand.u32 4294901760, %v1209_v21  ;;  %4443 = vmatmul.mubr.f32.gmra.mrb[24].mxu1 %v1408_v52  ;;  %v7055_v48 = vand.u32 4294901760, %v6248_v9  ;;  %v1428_v36 = vand.u32 4294901760, %v1427_v34 }
 0x146   :  { %v6263_v26 = vand.u32 4294901760, %v1208_v39  ;;  %5025 = vmatpush3.bf16.msra.mxu1 %v6021_v32  ;;  %v1418_v54 = vand.u32 4294901760, %v1417_v13  ;;  %v7056_v16 = vand.u32 4294901760, %v6255_v62 }
 0x147   :  { %v6268_v12 = vsub.f32 %v1209_v21, %v6260_v43  ;;  %5027 = vmatprep.subr.bf16.mxu1 %v6025_v3  ;;  %v1447_v63 = vsub.f32 %v6248_v9, %v7055_v48 }
 0x148   :  { %v6275_v61 = vsub.f32 %v1208_v39, %v6263_v26  ;;  %4445 = vmatprep.mubr.f32.mxu1 %v1418_v54  ;;  %v1437_v32 = vsub.f32 %v6255_v62, %v7056_v16  ;;  %v7100_v16 = vand.u32 4294901760, %v6123_v1 }
 0x149   :  { %4446 = vmatmul.mubr.f32.gmra.mrb[26].mxu1 %v1428_v36  ;;  %v7053_v52 = vand.u32 4294901760, %v6268_v12  ;;  %v1448_v13 = vand.u32 4294901760, %v1447_v63  ;;  %v5042_v63 = vpack.c.bf16 %v6081_v23, %v6076_v22 }
 0x14a   :  { %5029 = vmatpush3.bf16.msra.mxu1 %v6025_v3  ;;  %v1438_v21 = vand.u32 4294901760, %v1437_v32  ;;  %v7054_v34 = vand.u32 4294901760, %v6275_v61 }
 0x14b   :  { %5031 = vmatprep.subr.bf16.mxu1 %v6039_v60  ;;  %v1467_v39 = vsub.f32 %v6268_v12, %v7053_v52  ;;  %v7098_v52 = vand.u32 4294901760, %v6076_v22  ;;  %v7105_v22 = vand.u32 4294901760, %v6168_v59 }
 0x14c   :  { %4448 = vmatprep.mubr.f32.mxu1 %v1438_v21  ;;  %v1457_v54 = vsub.f32 %v6275_v61, %v7054_v34  ;;  %v7099_v34 = vand.u32 4294901760, %v6081_v23  ;;  %v7106_v23 = vld [vmem:[#allocation8_spill] sm:$0xff] }
 0x14d   :  { %4449 = vmatmul.mubr.f32.gmra.mrb[28].mxu1 %v1448_v13  ;;  %v1468_v3 = vand.u32 4294901760, %v1467_v39  ;;  %v7089_v39 = vld [vmem:[#allocation2_spill] sm:$0xff] }
 0x14e   :  { %5033 = vmatpush3.bf16.msra.mxu1 %v6039_v60  ;;  %v1458_v36 = vand.u32 4294901760, %v1457_v54  ;;  %v5046_v60 = vpack.c.bf16 %v6091_v51, %v6086_v42  ;;  %v7090_v54 = vld [vmem:[#allocation3_spill] sm:$0xff]  ;;  %v5106_v48 = vpack.c.bf16 %v7099_v34, %v7098_v52  ;;  %v7110_v34 = vand.u32 4294901760, %v6161_v2 }
 0x14f   :  { %5035 = vmatprep.subr.bf16.mxu1 %v6047_v40 }
 0x150   :  { %4451 = vmatprep.mubr.f32.mxu1 %v1458_v36  ;;  %v7091_v36 = vld [vmem:[#allocation4_spill] sm:$0xff] }
 0x151   :  { %4452 = vmatmul.mubr.f32.gmra.mrb[30].mxu1 %v1468_v3  ;;  %v7092_v3 = vld [vmem:[#allocation7_spill] sm:$0xff] }
 0x152   :  { %5037 = vmatpush3.bf16.msra.mxu1 %v6047_v40  ;;  %4486 = vmatprep.mubr.f32.mxu1 %v6120_v58  ;;  %v6329_v40 = vld [vmem:[%s7001_s5] sm:$0xff] }
 0x153   :  { %5039 = vmatprep.subr.bf16.mxu1 %v6051_v47 }
 0x155   :  { %4487 = vmatmul.mubr.f32.vlgmr.msra.gmra.mrb[16].mxu1 %v6118_v5 }
 0x156   :  { %5041 = vmatpush3.bf16.msra.mxu1 %v6051_v47  ;;  %4489 = vmatprep.mubr.f32.mxu1 %v6135_v45  ;;  %v6334_v47 = vld [vmem:[%s7001_s5 + $0x8] sm:$0xff] }
 0x157   :  { %5043 = vmatprep.subr.bf16.mxu1 %v5042_v63 }
 0x159   :  { %4490 = vmatmul.mubr.f32.gmra.mrb[18].mxu1 %v6131_v46 }
 0x15a   :  { %5045 = vmatpush3.bf16.msra.mxu1 %v5042_v63  ;;  %4492 = vmatprep.mubr.f32.mxu1 %v6157_v30  ;;  %v7093_v63 = vld [vmem:[#allocation5_spill] sm:$0xff] }
 0x15b   :  { %5047 = vmatprep.subr.bf16.mxu1 %v5046_v60 }
 0x15d   :  { %4493 = vmatmul.mubr.f32.gmra.mrb[20].mxu1 %v6154_v7 }
 0x15e   :  { %5049 = vmatpush3.bf16.msra.mxu1 %v5046_v60  ;;  %4495 = vmatprep.mubr.f32.mxu1 %v6177_v57  ;;  %v7094_v60 = vand.u32 4294901760, %v7093_v63  ;;  %v7103_v63 = vand.u32 4294901760, %v6091_v51  ;;  %v7112_v51 = vld [vmem:[#allocation10_spill] sm:$0xff] }
 0x15f   :  { %5051 = vmatprep.subr.bf16.mxu1 %v6055_v4 }
 0x161   :  { %4496 = vmatmul.mubr.f32.gmra.mrb[22].mxu1 %v6174_v49 }
 0x162   :  { %5053 = vmatpush3.bf16.msra.mxu1 %v6055_v4  ;;  %4498 = vmatprep.mubr.f32.mxu1 %v6199_v28  ;;  %v6339_v4 = vld [vmem:[%s7001_s5 + $0x10] sm:$0xff] }
 0x163   :  { %5055 = vmatprep.subr.bf16.mxu1 %v6059_v17 }
 0x165   :  { %4499 = vmatmul.mubr.f32.gmra.mrb[24].mxu1 %v6196_v44 }
 0x166   :  { %5057 = vmatpush3.bf16.msra.mxu1 %v6059_v17  ;;  %4501 = vmatprep.mubr.f32.mxu1 %v6221_v6  ;;  %v7052_v17 = vand.u32 4294901760, %v6329_v40 }
 0x167   :  { %5059 = vmatprep.subr.bf16.mxu1 %v6063_v31 }
 0x169   :  { %4502 = vmatmul.mubr.f32.gmra.mrb[26].mxu1 %v6218_v18 }
 0x16a   :  { %5061 = vmatpush3.bf16.msra.mxu1 %v6063_v31  ;;  %4504 = vmatprep.mubr.f32.mxu1 %v6243_v25  ;;  %v7051_v31 = vand.u32 4294901760, %v6334_v47 }
 0x16b   :  { %5063 = vmatprep.subr.bf16.mxu1 %v6067_v35 }
 0x16c   :  { %v6356_v21 = vpack.c.bf16 %v7051_v31, %v7052_v17  ;;  %v7097_v17 = vand.u32 4294901760, %v6127_v14 }
 0x16d   :  { %4505 = vmatmul.mubr.f32.gmra.mrb[28].mxu1 %v6240_v0 }
 0x16e   :  { %5065 = vmatpush3.bf16.msra.mxu1 %v6067_v35  ;;  %4507 = vmatprep.mubr.f32.mxu1 %v6263_v26  ;;  %v6347_v35 = vld [vmem:[%s7001_s5 + $0x18] sm:$0xff] }
 0x16f   :  { %5067 = vmatprep.subr.bf16.mxu1 %v6071_v20  ;;  %v7049_v32 = vand.u32 4294901760, %v6347_v35  ;;  %5167 = vmatprep.subr.bf16.mxu0 %v6356_v21 }
 0x170   :  { %5169 = vmatpush3.bf16.msra.mxu0 %v6356_v21 }
 0x171   :  { %4508 = vmatmul.mubr.f32.gmra.mrb[30].mxu1 %v6260_v43 }
 0x172   :  { %5069 = vmatpush3.bf16.msra.mxu1 %v6071_v20  ;;  %4542 = vmatprep.mubr.f32.mxu1 %v6127_v14  ;;  %v7050_v20 = vand.u32 4294901760, %v6339_v4 }
 0x173   :  { %5071 = vmatprep.subr.bf16.mxu1 %v5803_v38 }
 0x174   :  { %v6364_v13 = vpack.c.bf16 %v7049_v32, %v7050_v20  ;;  %v7095_v32 = vld [vmem:[#allocation6_spill] sm:$0xff] }
 0x175   :  { %4543 = vmatmul.mubr.f32.vlgmr.msra.gmra.mrb[16].mxu1 %v6123_v1  ;;  %v7096_v20 = vand.u32 4294901760, %v7095_v32  ;;  %v7101_v32 = vand.u32 4294901760, %v6148_v19  ;;  %v7107_v1 = vand.u32 4294901760, %v7106_v23  ;;  %v7128_v23 = vld [vmem:[#allocation17_spill] sm:$0xff] }
 0x176   :  { %5073 = vmatpush3.bf16.msra.mxu1 %v5803_v38  ;;  %4545 = vmatprep.mubr.f32.mxu1 %v6148_v19 }
 0x177   :  { %5075 = vmatprep.subr.bf16.mxu1 %v5865_v10  ;;  %5171 = vmatprep.subr.bf16.mxu0 %v6364_v13  ;;  %v5102_v31 = vpack.c.bf16 %v7096_v20, %v7094_v60  ;;  %v7102_v20 = vand.u32 4294901760, %v6086_v42  ;;  %v7111_v42 = vand.u32 4294901760, %v6190_v55  ;;  %v7116_v60 = vand.u32 4294901760, %v6182_v56 }
 0x178   :  { %5173 = vmatpush3.bf16.msra.mxu0 %v6364_v13 }
 0x179   :  { %4546 = vmatmul.mubr.f32.gmra.mrb[18].mxu1 %v6144_v37  ;;  %v5110_v14 = vpack.c.bf16 %v7103_v63, %v7102_v20  ;;  %v7119_v20 = vld [vmem:[#allocation13_spill] sm:$0xff] }
 0x17a   :  { %5077 = vmatpush3.bf16.msra.mxu1 %v5865_v10  ;;  %4548 = vmatprep.mubr.f32.mxu1 %v6168_v59  ;;  %v7120_v63 = vand.u32 4294901760, %v7119_v20 }
 0x17b   :  { %5079 = vmatprep.subr.bf16.mxu1 %v5879_v15 }
 0x17d   :  { %4549 = vmatmul.mubr.f32.gmra.mrb[20].mxu1 %v6161_v2  ;;  %v7117_v2 = vld [vmem:[#allocation12_spill] sm:$0xff] }
 0x17e   :  { %5081 = vmatpush3.bf16.msra.mxu1 %v5879_v15  ;;  %4551 = vmatprep.mubr.f32.mxu1 %v6190_v55 }
 0x17f   :  { %5083 = vmatprep.subr.bf16.mxu1 %v5914_v24 }
 0x181   :  { %4552 = vmatmul.mubr.f32.gmra.mrb[22].mxu1 %v6182_v56  ;;  %v7121_v56 = vld [vmem:[#allocation14_spill] sm:$0xff] }
 0x182   :  { %5085 = vmatpush3.bf16.msra.mxu1 %v5914_v24  ;;  %4554 = vmatprep.mubr.f32.mxu1 %v6212_v41 }
 0x183   :  { %5087 = vmatprep.subr.bf16.mxu1 %v7089_v39 }
 0x185   :  { %4555 = vmatmul.mubr.f32.gmra.mrb[24].mxu1 %v6204_v50  ;;  %v7126_v50 = vld [vmem:[#allocation16_spill] sm:$0xff] }
 0x186   :  { %5089 = vmatpush3.bf16.msra.mxu1 %v7089_v39  ;;  %4557 = vmatprep.mubr.f32.mxu1 %v6234_v11 }
 0x187   :  { %5091 = vmatprep.subr.bf16.mxu1 %v7090_v54 }
 0x189   :  { %4558 = vmatmul.mubr.f32.gmra.mrb[26].mxu1 %v6226_v53  ;;  %v7132_v53 = vand.u32 4294901760, %v6268_v12 }
 0x18a   :  { %5093 = vmatpush3.bf16.msra.mxu1 %v7090_v54  ;;  %4560 = vmatprep.mubr.f32.mxu1 %v6255_v62 }
 0x18b   :  { %5095 = vmatprep.subr.bf16.mxu1 %v7091_v36 }
 0x18d   :  { %4561 = vmatmul.mubr.f32.gmra.mrb[28].mxu1 %v6248_v9 }
 0x18e   :  { %5097 = vmatpush3.bf16.msra.mxu1 %v7091_v36  ;;  %4563 = vmatprep.mubr.f32.mxu1 %v6275_v61 }
 0x18f   :  { %5099 = vmatprep.subr.bf16.mxu1 %v7092_v3 }
 0x191   :  { %4564 = vmatmul.mubr.f32.gmra.mrb[30].mxu1 %v6268_v12 }
 0x192   :  { %5101 = vmatpush3.bf16.msra.mxu1 %v7092_v3  ;;  %4598 = vmatprep.mubr.f32.mxu1 %v7097_v17  ;;  %v7104_v17 = vand.u32 4294901760, %v6144_v37  ;;  %v7113_v37 = vand.u32 4294901760, %v7112_v51 }
 0x193   :  { %5103 = vmatprep.subr.bf16.mxu1 %v5102_v31 }
 0x195   :  { %4599 = vmatmul.mubr.f32.vlgmr.msra.gmra.mrb[16].mxu1 %v7100_v16  ;;  %v7108_v16 = vld [vmem:[#allocation9_spill] sm:$0xff] }
 0x196   :  { %5105 = vmatpush3.bf16.msra.mxu1 %v5102_v31  ;;  %4601 = vmatprep.mubr.f32.mxu1 %v7101_v32  ;;  %v7109_v52 = vand.u32 4294901760, %v7108_v16  ;;  %v7118_v32 = vand.u32 4294901760, %v7117_v2  ;;  %v7131_v16 = vand.u32 4294901760, %v6275_v61 }
 0x197   :  { %5107 = vmatprep.subr.bf16.mxu1 %v5106_v48 }
 0x198   :  { %v5114_v19 = vpack.c.bf16 %v7109_v52, %v7107_v1  ;;  %v5122_v55 = vpack.c.bf16 %v7120_v63, %v7118_v32  ;;  %v7129_v1 = vand.u32 4294901760, %v7128_v23  ;;  %v7135_v32 = vand.u32 4294901760, %v6339_v4 }
 0x199   :  { %4602 = vmatmul.mubr.f32.gmra.mrb[18].mxu1 %v7104_v17  ;;  %v7123_v17 = vld [vmem:[#allocation15_spill] sm:$0xff]  ;;  %v7136_v63 = vand.u32 4294901760, %v6347_v35 }
 0x19a   :  { %5109 = vmatpush3.bf16.msra.mxu1 %v5106_v48  ;;  %4604 = vmatprep.mubr.f32.mxu1 %v7105_v22  ;;  %v7114_v48 = vld [vmem:[#allocation11_spill] sm:$0xff]  ;;  %v7124_v22 = vand.u32 4294901760, %v7123_v17  ;;  %v6593_v20 = vsub.f32 %v6339_v4, %v7135_v32 }
 0x19b   :  { %5111 = vmatprep.subr.bf16.mxu1 %v5110_v14  ;;  %v7115_v31 = vand.u32 4294901760, %v7114_v48 }
 0x19c   :  { %v2849_v17 = vand.u32 4294901760, %v6593_v20 }
 0x19d   :  { %4605 = vmatmul.mubr.f32.gmra.mrb[20].mxu1 %v7110_v34  ;;  %v5118_v59 = vpack.c.bf16 %v7115_v31, %v7113_v37 }
 0x19e   :  { %5113 = vmatpush3.bf16.msra.mxu1 %v5110_v14  ;;  %4607 = vmatprep.mubr.f32.mxu1 %v7111_v42  ;;  %v7122_v14 = vand.u32 4294901760, %v7121_v56  ;;  %v6603_v56 = vld [vmem:[%s7002_s4] ss:$0 sm:$0xff]  ;;  %v2850_v23 = vsub.f32 %v6593_v20, %v2849_v17 }
 0x19f   :  { %5115 = vmatprep.subr.bf16.mxu1 %v5114_v19 }
 0x1a0   :  { %v5126_v41 = vpack.c.bf16 %v7124_v22, %v7122_v14 }
 0x1a1   :  { %4608 = vmatmul.mubr.f32.gmra.mrb[22].mxu1 %v7116_v60 }
 0x1a2   :  { %5117 = vmatpush3.bf16.msra.mxu1 %v5114_v19  ;;  %4610 = vmatprep.mubr.f32.mxu1 %v1396_v8  ;;  %v7125_v8 = vand.u32 4294901760, %v6255_v62 }
 0x1a3   :  { %5119 = vmatprep.subr.bf16.mxu1 %v5118_v59 }
 0x1a5   :  { %4611 = vmatmul.mubr.f32.gmra.mrb[24].mxu1 %v1406_v27  ;;  %v7127_v27 = vand.u32 4294901760, %v7126_v50 }
 0x1a6   :  { %5121 = vmatpush3.bf16.msra.mxu1 %v5118_v59  ;;  %4613 = vmatprep.mubr.f32.mxu1 %v1416_v29  ;;  %v7130_v29 = vand.u32 4294901760, %v6248_v9 }
 0x1a7   :  { %5123 = vmatprep.subr.bf16.mxu1 %v5122_v55  ;;  %v5130_v11 = vpack.c.bf16 %v7129_v1, %v7127_v27 }
 0x1a9   :  { %4614 = vmatmul.mubr.f32.gmra.mrb[26].mxu1 %v1426_v33 }
 0x1aa   :  { %5125 = vmatpush3.bf16.msra.mxu1 %v5122_v55  ;;  %4616 = vmatprep.mubr.f32.mxu1 %v7125_v8  ;;  %v6598_v55 = vsub.f32 %v6347_v35, %v7136_v63 }
 0x1ab   :  { %5127 = vmatprep.subr.bf16.mxu1 %v5126_v41 }
 0x1ac   :  { %v2856_v8 = vand.u32 4294901760, %v6598_v55 }
 0x1ad   :  { %4617 = vmatmul.mubr.f32.gmra.mrb[28].mxu1 %v7130_v29 }
 0x1ae   :  { %5129 = vmatpush3.bf16.msra.mxu1 %v5126_v41  ;;  %4619 = vmatprep.mubr.f32.mxu1 %v7131_v16  ;;  %v2857_v16 = vsub.f32 %v6598_v55, %v2856_v8 }
 0x1af   :  { %5131 = vmatprep.subr.bf16.mxu1 %v5130_v11 }
 0x1b1   :  { %4620 = vmatmul.mubr.f32.gmra.mrb[30].mxu1 %v7132_v53 }
 0x1b2   :  { %5133 = vmatpush3.bf16.msra.mxu1 %v5130_v11  ;;  %4654 = vmatprep.mubr.f32.mxu1 %v6120_v58 }
 0x1b3   :  { %5135 = vmatprep.subr.bf16.mxu1 %v5803_v38 }
 0x1b5   :  { %4655 = vmatmul.mubr.f32.vlgmr.msra.gmra.mrb[16].mxu1 %v6118_v5 }
 0x1b6   :  { %5137 = vmatpush3.bf16.msra.mxu1 %v5803_v38  ;;  %4657 = vmatprep.mubr.f32.mxu1 %v6135_v45  ;;  %v2539_v38 = vld [vmem:[%s7001_s5 + $0x20] sm:$0xff] }
 0x1b7   :  { %5139 = vmatprep.subr.bf16.mxu1 %v5865_v10 }
 0x1b9   :  { %4658 = vmatmul.mubr.f32.gmra.mrb[18].mxu1 %v6131_v46 }
 0x1ba   :  { %5141 = vmatpush3.bf16.msra.mxu1 %v5865_v10  ;;  %4660 = vmatprep.mubr.f32.mxu1 %v6157_v30  ;;  %v2540_v10 = vld [vmem:[%s7001_s5 + $0x28] sm:$0xff] }
 0x1bb   :  { %5143 = vmatprep.subr.bf16.mxu1 %v5879_v15 }
 0x1bd   :  { %4661 = vmatmul.mubr.f32.gmra.mrb[20].mxu1 %v6154_v7 }
 0x1be   :  { %5145 = vmatpush3.bf16.msra.mxu1 %v5879_v15  ;;  %4663 = vmatprep.mubr.f32.mxu1 %v6177_v57  ;;  %v2612_v15 = vand.u32 4294901760, %v2539_v38 }
 0x1bf   :  { %5147 = vmatprep.subr.bf16.mxu1 %v5914_v24 }
 0x1c1   :  { %4664 = vmatmul.mubr.f32.gmra.mrb[22].mxu1 %v6174_v49 }
 0x1c2   :  { %5149 = vmatpush3.bf16.msra.mxu1 %v5914_v24  ;;  %4666 = vmatprep.mubr.f32.mxu1 %v6199_v28  ;;  %v2615_v24 = vand.u32 4294901760, %v2540_v10 }
 0x1c3   :  { %5151 = vmatprep.subr.bf16.mxu1 %v7089_v39 }
 0x1c5   :  { %4667 = vmatmul.mubr.f32.gmra.mrb[24].mxu1 %v6196_v44 }
 0x1c6   :  { %5153 = vmatpush3.bf16.msra.mxu1 %v7089_v39  ;;  %4669 = vmatprep.mubr.f32.mxu1 %v6221_v6 }
 0x1c7   :  { %5155 = vmatprep.subr.bf16.mxu1 %v7090_v54 }
 0x1c9   :  { %4670 = vmatmul.mubr.f32.gmra.mrb[26].mxu1 %v6218_v18 }
 0x1ca   :  { %5157 = vmatpush3.bf16.msra.mxu1 %v7090_v54  ;;  %4672 = vmatprep.mubr.f32.mxu1 %v6243_v25 }
 0x1cb   :  { %5159 = vmatprep.subr.bf16.mxu1 %v7091_v36 }
 0x1cd   :  { %4673 = vmatmul.mubr.f32.gmra.mrb[28].mxu1 %v6240_v0 }
 0x1ce   :  { %5161 = vmatpush3.bf16.msra.mxu1 %v7091_v36  ;;  %4675 = vmatprep.mubr.f32.mxu1 %v6263_v26 }
 0x1cf   :  { %5163 = vmatprep.subr.bf16.mxu1 %v7092_v3 }
 0x1d1   :  { %4676 = vmatmul.mubr.f32.gmra.mrb[30].mxu1 %v6260_v43 }
 0x1d2   :  { %5165 = vmatpush3.bf16.msra.mxu1 %v7092_v3  ;;  %4710 = vmatprep.mubr.f32.mxu1 %v6120_v58 }
 0x1d5   :  { %4711 = vmatmul.mubr.f32.vlgmr.msra.gmra.mrb[16].mxu1 %v6118_v5 }
 0x1d6   :  { %4713 = vmatprep.mubr.f32.mxu1 %v6135_v45  ;;  %v7134_v45 = vand.u32 4294901760, %v6334_v47 }
 0x1d9   :  { %4714 = vmatmul.mubr.f32.gmra.mrb[18].mxu1 %v6131_v46 }
 0x1da   :  { %4716 = vmatprep.mubr.f32.mxu1 %v6157_v30 }
 0x1dd   :  { %4717 = vmatmul.mubr.f32.gmra.mrb[20].mxu1 %v6154_v7  ;;  %v7133_v7 = vand.u32 4294901760, %v6329_v40 }
 0x1de   :  { %4719 = vmatprep.mubr.f32.mxu1 %v6177_v57  ;;  %v2542_v57 = vld [vmem:[%s7001_s5 + $0x38] sm:$0xff] }
 0x1df   :  { %v2621_v5 = vand.u32 4294901760, %v2542_v57  ;;  %v6532_v46 = vsub.f32 %v6329_v40, %v7133_v7 }
 0x1e1   :  { %4720 = vmatmul.mubr.f32.gmra.mrb[22].mxu1 %v6174_v49  ;;  %v6537_v49 = vsub.f32 %v6334_v47, %v7134_v45  ;;  %v6564_v54 = vsub.f32 %v2542_v57, %v2621_v5 }
 0x1e2   :  { %4722 = vmatprep.mubr.f32.mxu1 %v6199_v28  ;;  %v2541_v28 = vld [vmem:[%s7001_s5 + $0x30] sm:$0xff] }
 0x1e3   :  { %v2618_v58 = vand.u32 4294901760, %v2541_v28  ;;  %v7057_v19 = vand.u32 4294901760, %v6564_v54  ;;  %v6580_v59 = vpack.c.bf16 %v6537_v49, %v6532_v46 }
 0x1e5   :  { %4723 = vmatmul.mubr.f32.gmra.mrb[24].mxu1 %v6196_v44  ;;  %v6525_v30 = vpack.c.bf16 %v2621_v5, %v2618_v58  ;;  %v2835_v44 = vand.u32 4294901760, %v6532_v46  ;;  %v6562_v39 = vsub.f32 %v2541_v28, %v2618_v58  ;;  %v2885_v51 = vsub.f32 %v6564_v54, %v7057_v19 }
 0x1e6   :  { %4725 = vmatprep.mubr.f32.mxu1 %v6221_v6  ;;  %v6515_v6 = vpack.c.bf16 %v2615_v24, %v2612_v15  ;;  %v2851_v5 = vand.u32 4294901760, %v2850_v23 }
 0x1e7   :  { %v7058_v52 = vand.u32 4294901760, %v6562_v39  ;;  %v2886_v48 = vand.u32 4294901760, %v2885_v51  ;;  %v6588_v2 = vpack.c.bf16 %v6564_v54, %v6562_v39 }
 0x1e8   :  { %5175 = vmatprep.subr.bf16.mxu0 %v6515_v6 }
 0x1e9   :  { %4726 = vmatmul.mubr.f32.gmra.mrb[26].mxu1 %v6218_v18  ;;  %5177 = vmatpush3.bf16.msra.mxu0 %v6515_v6  ;;  %v2842_v18 = vand.u32 4294901760, %v6537_v49  ;;  %v2878_v42 = vsub.f32 %v6562_v39, %v7058_v52 }
 0x1ea   :  { %4728 = vmatprep.mubr.f32.mxu1 %v6243_v25  ;;  %5179 = vmatprep.subr.bf16.mxu0 %v6525_v30 }
 0x1eb   :  { %v2843_v33 = vsub.f32 %v6537_v49, %v2842_v18  ;;  %v2879_v37 = vand.u32 4294901760, %v2878_v42 }
 0x1ed   :  { %4729 = vmatmul.mubr.f32.gmra.mrb[28].mxu1 %v6240_v0  ;;  %5181 = vmatpush3.bf16.msra.mxu0 %v6525_v30  ;;  %v2836_v0 = vsub.f32 %v6532_v46, %v2835_v44  ;;  %v2844_v9 = vand.u32 4294901760, %v2843_v33  ;;  %v6576_v31 = vpack.c.bf16 %v2886_v48, %v2879_v37  ;;  %v5234_v46 = vpack.c.bf16 %v2856_v8, %v2849_v17 }
 0x1ee   :  { %4731 = vmatprep.mubr.f32.mxu1 %v6263_v26  ;;  %v6552_v26 = vsub.f32 %v2540_v10, %v2615_v24  ;;  %v7144_v17 = vand.u32 4294901760, %v6564_v54 }
 0x1ef   :  { %v2837_v25 = vand.u32 4294901760, %v2836_v0 }
 0x1f0   :  { %v7063_v61 = vand.u32 4294901760, %v6552_v26 }
 0x1f1   :  { %4732 = vmatmul.mubr.f32.gmra.mrb[30].mxu1 %v6260_v43  ;;  %v6547_v62 = vpack.c.bf16 %v2844_v9, %v2837_v25  ;;  %v6550_v43 = vsub.f32 %v2539_v38, %v2612_v15  ;;  %v2858_v25 = vand.u32 4294901760, %v2857_v16 }
 0x1f2   :  { %v2871_v47 = vsub.f32 %v6552_v26, %v7063_v61 }
 0x1f3   :  { %5183 = vmatprep.subr.bf16.mxu0 %v6547_v62  ;;  %v7065_v12 = vand.u32 4294901760, %v6550_v43  ;;  %v6584_v60 = vpack.c.bf16 %v6552_v26, %v6550_v43 }
 0x1f4   :  { %v2872_v3 = vand.u32 4294901760, %v2871_v47 }
 0x1f5   :  { %v2864_v40 = vsub.f32 %v6550_v43, %v7065_v12 }
 0x1f7   :  { %v2865_v36 = vand.u32 4294901760, %v2864_v40 }
 0x1f9   :  { %v6568_v34 = vpack.c.bf16 %v2872_v3, %v2865_v36 }
 0x2a8   :  { %v4712_v14 = vpop.f32.mrb[16].mxu1 }
 0x2a9   :  { %v5294_v22 = vadd.f32 %v4712_v14, %v6603_v56  ;;  %v2425_v41 = vpop.f32.mrb[17].mxu1 }
 0x2aa   :  { %v5295_v4 = vadd.f32 %v6603_v56, %v2425_v41 }
 0x2ab   :  { %v2520_v50 = vmax.f32 %v5294_v22, 0.0 }
 0x2ac   :  { %v2519_v27 = vmax.f32 %v5295_v4, 0.0  ;;  %v4715_v35 = vpop.f32.mrb[18].mxu1 }
 0x2ad   :  { %v2555_v1 = vsel %vm2550_vm2, %v2520_v50, 0  ;;  %v5296_v11 = vadd.f32 %v4715_v35, %v6603_v56  ;;  %v2437_v29 = vpop.f32.mrb[19].mxu1 }
 0x2ae   :  { %v6617_v53 = vand.u32 4294901760, %v2555_v1  ;;  %v2552_v38 = vsel %vm2550_vm2, %v2519_v27, 0  ;;  %v5297_v10 = vadd.f32 %v6603_v56, %v2437_v29 }
 0x2af   :  { %v6621_v15 = vand.u32 4294901760, %v2552_v38  ;;  %v2522_v24 = vmax.f32 %v5296_v11, 0.0 }
 0x2b0   :  { %v6624_v28 = vsub.f32 %v2555_v1, %v6617_v53  ;;  %v2521_v57 = vmax.f32 %v5297_v10, 0.0  ;;  %v4718_v58 = vpop.f32.mrb[20].mxu1  ;;  %v5186_v1 = vpack.c.bf16 %v2858_v25, %v2851_v5 }
 0x2b1   :  { %v6627_v7 = vsub.f32 %v2552_v38, %v6621_v15  ;;  %v2561_v45 = vsel %vm2550_vm2, %v2522_v24, 0  ;;  %v5298_v0 = vadd.f32 %v4718_v58, %v6603_v56  ;;  %v2449_v33 = vpop.f32.mrb[21].mxu1 }
 0x2b2   :  { %v7071_v9 = vand.u32 4294901760, %v6624_v28  ;;  %v6632_v40 = vand.u32 4294901760, %v2561_v45  ;;  %v2558_v47 = vsel %vm2550_vm2, %v2521_v57, 0  ;;  %v5299_v36 = vadd.f32 %v6603_v56, %v2449_v33 }
 0x2b3   :  { %v6636_v3 = vand.u32 4294901760, %v2558_v47  ;;  %v2524_v42 = vmax.f32 %v5298_v0, 0.0  ;;  %v2674_v51 = vand.u32 4294901760, %v6627_v7  ;;  %v7137_v49 = vand.u32 4294901760, %v6624_v28 }
 0x2b4   :  { %v2685_v37 = vsub.f32 %v6624_v28, %v7071_v9  ;;  %v6643_v48 = vsub.f32 %v2561_v45, %v6632_v40  ;;  %v2523_v32 = vmax.f32 %v5299_v36, 0.0  ;;  %v4721_v63 = vpop.f32.mrb[22].mxu1 }
 0x2b5   :  { %v6646_v14 = vsub.f32 %v2558_v47, %v6636_v3  ;;  %v2567_v22 = vsel %vm2550_vm2, %v2524_v42, 0  ;;  %v5300_v41 = vadd.f32 %v4721_v63, %v6603_v56  ;;  %v2461_v4 = vpop.f32.mrb[23].mxu1  ;;  %v2675_v50 = vsub.f32 %v6627_v7, %v2674_v51 }
 0x2b6   :  { %v6653_v27 = vand.u32 4294901760, %v2567_v22  ;;  %v2564_v35 = vsel %vm2550_vm2, %v2523_v32, 0  ;;  %v5301_v23 = vadd.f32 %v6603_v56, %v2461_v4  ;;  %v2686_v10 = vand.u32 4294901760, %v2685_v37 }
 0x2b7   :  { %v6657_v11 = vand.u32 4294901760, %v2564_v35  ;;  %v2526_v29 = vmax.f32 %v5300_v41, 0.0  ;;  %v2676_v16 = vand.u32 4294901760, %v2675_v50  ;;  %v7067_v38 = vand.u32 4294901760, %v6646_v14 }
 0x2b8   :  { %v6661_v24 = vsub.f32 %v2567_v22, %v6653_v27  ;;  %v2525_v57 = vmax.f32 %v5301_v23, 0.0  ;;  %v4724_v58 = vpop.f32.mrb[24].mxu1  ;;  %v7062_v45 = vand.u32 4294901760, %v6643_v48 }
 0x2b9   :  { %v6665_v0 = vsub.f32 %v2564_v35, %v6657_v11  ;;  %v2573_v33 = vsel %vm2550_vm2, %v2526_v29, 0  ;;  %v5302_v5 = vadd.f32 %v4724_v58, %v6603_v56  ;;  %v2473_v25 = vpop.f32.mrb[25].mxu1  ;;  %4750 = vmatprep.mubr.f32.mxu0 %v2676_v16  ;;  %v2695_v47 = vsub.f32 %v6646_v14, %v7067_v38 }
 0x2ba   :  { %v6672_v36 = vand.u32 4294901760, %v2573_v33  ;;  %v2570_v42 = vsel %vm2550_vm2, %v2525_v57, 0  ;;  %v5303_v37 = vadd.f32 %v6603_v56, %v2473_v25  ;;  %4751 = vmatmul.mubr.f32.vlgmr.msra.gmra.mrb[16].mxu0 %v2686_v10  ;;  %v2705_v32 = vsub.f32 %v6643_v48, %v7062_v45 }
 0x2bb   :  { %v6679_v63 = vand.u32 4294901760, %v2570_v42  ;;  %v2528_v22 = vmax.f32 %v5302_v5, 0.0  ;;  %5185 = vmatpush3.bf16.msra.mxu0 %v6547_v62  ;;  %v2696_v41 = vand.u32 4294901760, %v2695_v47  ;;  %v7060_v4 = vand.u32 4294901760, %v6665_v0 }
 0x2bc   :  { %v6684_v50 = vsub.f32 %v2573_v33, %v6672_v36  ;;  %v2527_v35 = vmax.f32 %v5303_v37, 0.0  ;;  %v4727_v23 = vpop.f32.mrb[26].mxu1  ;;  %v2706_v29 = vand.u32 4294901760, %v2705_v32  ;;  %5187 = vmatprep.subr.bf16.mxu0 %v5186_v1  ;;  %v7059_v16 = vand.u32 4294901760, %v6661_v24 }
 0x2bd   :  { %v6688_v10 = vsub.f32 %v2570_v42, %v6679_v63  ;;  %v2579_v57 = vsel %vm2550_vm2, %v2528_v22, 0  ;;  %v5304_v58 = vadd.f32 %v4727_v23, %v6603_v56  ;;  %v2485_v62 = vpop.f32.mrb[27].mxu1  ;;  %4753 = vmatprep.mubr.f32.mxu0 %v2696_v41  ;;  %v2715_v33 = vsub.f32 %v6665_v0, %v7060_v4 }
 0x2be   :  { %v6695_v5 = vand.u32 4294901760, %v2579_v57  ;;  %v2576_v25 = vsel %vm2550_vm2, %v2527_v35, 0  ;;  %v5305_v47 = vadd.f32 %v6603_v56, %v2485_v62  ;;  %4754 = vmatmul.mubr.f32.gmra.mrb[18].mxu0 %v2706_v29  ;;  %v2725_v42 = vsub.f32 %v6661_v24, %v7059_v16 }
 0x2bf   :  { %v6702_v37 = vand.u32 4294901760, %v2576_v25  ;;  %v2530_v32 = vmax.f32 %v5304_v58, 0.0  ;;  %v2716_v22 = vand.u32 4294901760, %v2715_v33  ;;  %5189 = vmatpush3.bf16.msra.mxu0 %v5186_v1  ;;  %v7061_v41 = vand.u32 4294901760, %v6688_v10 }
 0x2c0   :  { %v6706_v23 = vsub.f32 %v2579_v57, %v6695_v5  ;;  %v2529_v19 = vmax.f32 %v5305_v47, 0.0  ;;  %v4730_v52 = vpop.f32.mrb[28].mxu1  ;;  %v2726_v35 = vand.u32 4294901760, %v2725_v42  ;;  %v7064_v62 = vand.u32 4294901760, %v6684_v50  ;;  %5191 = vmatprep.subr.bf16.mxu0 %v6568_v34 }
 0x2c1   :  { %v6711_v29 = vsub.f32 %v2576_v25, %v6702_v37  ;;  %v2585_v16 = vsel %vm2550_vm2, %v2530_v32, 0  ;;  %v5306_v58 = vadd.f32 %v4730_v52, %v6603_v56  ;;  %v2497_v1 = vpop.f32.mrb[29].mxu1  ;;  %4756 = vmatprep.mubr.f32.mxu0 %v2716_v22  ;;  %v2735_v57 = vsub.f32 %v6688_v10, %v7061_v41 }
 0x2c2   :  { %v6718_v33 = vand.u32 4294901760, %v2585_v16  ;;  %v2582_v47 = vsel %vm2550_vm2, %v2529_v19, 0  ;;  %v5307_v42 = vadd.f32 %v6603_v56, %v2497_v1  ;;  %4757 = vmatmul.mubr.f32.gmra.mrb[20].mxu0 %v2726_v35  ;;  %v2745_v25 = vsub.f32 %v6684_v50, %v7064_v62 }
 0x2c3   :  { %v6725_v32 = vand.u32 4294901760, %v2582_v47  ;;  %v2532_v52 = vmax.f32 %v5306_v58, 0.0  ;;  %v2736_v4 = vand.u32 4294901760, %v2735_v57  ;;  %v7066_v22 = vand.u32 4294901760, %v6711_v29  ;;  %5193 = vmatpush3.bf16.msra.mxu0 %v6568_v34 }
 0x2c4   :  { %v6730_v41 = vsub.f32 %v2585_v16, %v6718_v33  ;;  %v2531_v45 = vmax.f32 %v5307_v42, 0.0  ;;  %v4733_v19 = vpop.f32.mrb[30].mxu1  ;;  %v2746_v61 = vand.u32 4294901760, %v2745_v25  ;;  %v7070_v35 = vand.u32 4294901760, %v6706_v23  ;;  %5195 = vmatprep.subr.bf16.mxu0 %v6576_v31 }
 0x2c5   :  { %v6735_v1 = vsub.f32 %v2582_v47, %v6725_v32  ;;  %v2591_v58 = vsel %vm2550_vm2, %v2532_v52, 0  ;;  %v5308_v57 = vadd.f32 %v4733_v19, %v6603_v56  ;;  %v2509_v62 = vpop.f32.mrb[31].mxu1  ;;  %4759 = vmatprep.mubr.f32.mxu0 %v2736_v4  ;;  %v2755_v34 = vsub.f32 %v6711_v29, %v7066_v22 }
 0x2c6   :  { %v6742_v16 = vand.u32 4294901760, %v2591_v58  ;;  %v2588_v42 = vsel %vm2550_vm2, %v2531_v45, 0  ;;  %v5309_v25 = vadd.f32 %v6603_v56, %v2509_v62  ;;  %4760 = vmatmul.mubr.f32.gmra.mrb[22].mxu0 %v2746_v61  ;;  %v2765_v47 = vsub.f32 %v6706_v23, %v7070_v35 }
 0x2c7   :  { %v6749_v52 = vand.u32 4294901760, %v2588_v42  ;;  %v2534_v19 = vmax.f32 %v5308_v57, 0.0  ;;  %v2756_v12 = vand.u32 4294901760, %v2755_v34  ;;  %v7068_v4 = vand.u32 4294901760, %v6735_v1  ;;  %5197 = vmatpush3.bf16.msra.mxu0 %v6576_v31 }
 0x2c8   :  { %v6754_v22 = vsub.f32 %v2591_v58, %v6742_v16  ;;  %v2533_v38 = vmax.f32 %v5309_v25, 0.0  ;;  %v2766_v45 = vand.u32 4294901760, %v2765_v47  ;;  %v7069_v56 = vand.u32 4294901760, %v6730_v41  ;;  %5199 = vmatprep.subr.bf16.mxu0 %v6580_v59 }
 0x2c9   :  { %v6759_v61 = vsub.f32 %v2588_v42, %v6749_v52  ;;  %v2597_v62 = vsel %vm2550_vm2, %v2534_v19, 0  ;;  %4762 = vmatprep.mubr.f32.mxu0 %v2756_v12  ;;  %v2775_v57 = vsub.f32 %v6735_v1, %v7068_v4  ;;  %v7150_v54 = vand.u32 4294901760, %v6735_v1 }
 0x2ca   :  { %v6765_v31 = vand.u32 4294901760, %v2597_v62  ;;  %v2594_v58 = vsel %vm2550_vm2, %v2533_v38, 0  ;;  %4763 = vmatmul.mubr.f32.gmra.mrb[24].mxu0 %v2766_v45  ;;  %v2785_v34 = vsub.f32 %v6730_v41, %v7069_v56  ;;  %v7072_v25 = vand.u32 4294901760, %v6754_v22 }
 0x2cb   :  { %v6772_v42 = vand.u32 4294901760, %v2594_v58  ;;  %v2776_v47 = vand.u32 4294901760, %v2775_v57  ;;  %v2794_v12 = vand.u32 4294901760, %v6759_v61 }
 0x2cc   :  { %v6776_v19 = vsub.f32 %v2597_v62, %v6765_v31  ;;  %v2786_v4 = vand.u32 4294901760, %v2785_v34  ;;  %v2805_v38 = vsub.f32 %v6754_v22, %v7072_v25 }
 0x2cd   :  { %v6782_v45 = vsub.f32 %v2594_v58, %v6772_v42  ;;  %4765 = vmatprep.mubr.f32.mxu0 %v2776_v47  ;;  %v2795_v56 = vsub.f32 %v6759_v61, %v2794_v12 }
 0x2ce   :  { %4766 = vmatmul.mubr.f32.gmra.mrb[26].mxu0 %v2786_v4  ;;  %v2824_v57 = vand.u32 4294901760, %v6776_v19  ;;  %v2806_v9 = vand.u32 4294901760, %v2805_v38  ;;  %v5202_v4 = vpack.c.bf16 %v6598_v55, %v6593_v20  ;;  %v7142_v20 = vand.u32 4294901760, %v6665_v0 }
 0x2cf   :  { %v2796_v35 = vand.u32 4294901760, %v2795_v56  ;;  %v2814_v62 = vand.u32 4294901760, %v6782_v45  ;;  %v7143_v55 = vand.u32 4294901760, %v6562_v39  ;;  %v7149_v39 = vand.u32 4294901760, %v6706_v23 }
 0x2d0   :  { %v2825_v34 = vsub.f32 %v6776_v19, %v2824_v57 }
 0x2d1   :  { %4768 = vmatprep.mubr.f32.mxu0 %v2796_v35  ;;  %v2815_v58 = vsub.f32 %v6782_v45, %v2814_v62  ;;  %v5242_v8 = vpack.c.bf16 %v7144_v17, %v7143_v55 }
 0x2d2   :  { %4769 = vmatmul.mubr.f32.gmra.mrb[28].mxu0 %v2806_v9  ;;  %v2826_v25 = vand.u32 4294901760, %v2825_v34  ;;  %v7148_v9 = vand.u32 4294901760, %v6711_v29 }
 0x2d3   :  { %v2816_v47 = vand.u32 4294901760, %v2815_v58 }
 0x2d5   :  { %4771 = vmatprep.mubr.f32.mxu0 %v2816_v47 }
 0x2d6   :  { %4772 = vmatmul.mubr.f32.gmra.mrb[30].mxu0 %v2826_v25 }
 0x2d7   :  { %4790 = vmatprep.mubr.f32.mxu0 %v6621_v15 }
 0x2da   :  { %4791 = vmatmul.mubr.f32.vlgmr.msra.gmra.mrb[16].mxu0 %v6617_v53 }
 0x2db   :  { %5201 = vmatpush3.bf16.msra.mxu0 %v6580_v59  ;;  %4793 = vmatprep.mubr.f32.mxu0 %v6636_v3  ;;  %v5230_v59 = vpack.c.bf16 %v2842_v18, %v2835_v44  ;;  %v7138_v44 = vand.u32 4294901760, %v6646_v14  ;;  %v7139_v18 = vand.u32 4294901760, %v6550_v43  ;;  %v7146_v43 = vand.u32 4294901760, %v6688_v10 }
 0x2dc   :  { %5203 = vmatprep.subr.bf16.mxu0 %v5202_v4 }
 0x2de   :  { %4794 = vmatmul.mubr.f32.gmra.mrb[18].mxu0 %v6632_v40 }
 0x2df   :  { %4796 = vmatprep.mubr.f32.mxu0 %v6657_v11  ;;  %5205 = vmatpush3.bf16.msra.mxu0 %v5202_v4 }
 0x2e0   :  { %5207 = vmatprep.subr.bf16.mxu0 %v6584_v60 }
 0x2e2   :  { %4797 = vmatmul.mubr.f32.gmra.mrb[20].mxu0 %v6653_v27 }
 0x2e3   :  { %4799 = vmatprep.mubr.f32.mxu0 %v6679_v63  ;;  %5209 = vmatpush3.bf16.msra.mxu0 %v6584_v60  ;;  %v7140_v60 = vand.u32 4294901760, %v6552_v26  ;;  %v7147_v26 = vand.u32 4294901760, %v6684_v50 }
 0x2e4   :  { %5211 = vmatprep.subr.bf16.mxu0 %v6588_v2 }
 0x2e6   :  { %4800 = vmatmul.mubr.f32.gmra.mrb[22].mxu0 %v6672_v36 }
 0x2e7   :  { %4802 = vmatprep.mubr.f32.mxu0 %v6702_v37  ;;  %5213 = vmatpush3.bf16.msra.mxu0 %v6588_v2  ;;  %v5238_v2 = vpack.c.bf16 %v7140_v60, %v7139_v18 }
 0x2e8   :  { %5215 = vmatprep.subr.bf16.mxu0 %v6356_v21 }
 0x2ea   :  { %4803 = vmatmul.mubr.f32.gmra.mrb[24].mxu0 %v6695_v5 }
 0x2eb   :  { %4805 = vmatprep.mubr.f32.mxu0 %v6725_v32 }
 0x2ee   :  { %4806 = vmatmul.mubr.f32.gmra.mrb[26].mxu0 %v6718_v33 }
 0x2ef   :  { %4808 = vmatprep.mubr.f32.mxu0 %v6749_v52 }
 0x2f2   :  { %4809 = vmatmul.mubr.f32.gmra.mrb[28].mxu0 %v6742_v16 }
 0x2f3   :  { %4811 = vmatprep.mubr.f32.mxu0 %v6772_v42 }
 0x2f6   :  { %4812 = vmatmul.mubr.f32.gmra.mrb[30].mxu0 %v6765_v31 }
 0x2f7   :  { %4830 = vmatprep.mubr.f32.mxu0 %v6627_v7  ;;  %v7141_v7 = vand.u32 4294901760, %v6643_v48 }
 0x2fa   :  { %4831 = vmatmul.mubr.f32.vlgmr.msra.gmra.mrb[16].mxu0 %v6624_v28  ;;  %v7145_v28 = vand.u32 4294901760, %v6661_v24 }
 0x2fb   :  { %5217 = vmatpush3.bf16.msra.mxu0 %v6356_v21  ;;  %4833 = vmatprep.mubr.f32.mxu0 %v6646_v14 }
 0x2fc   :  { %5219 = vmatprep.subr.bf16.mxu0 %v6364_v13 }
 0x2fe   :  { %4834 = vmatmul.mubr.f32.gmra.mrb[18].mxu0 %v6643_v48  ;;  %v7152_v48 = vand.u32 4294901760, %v6754_v22 }
 0x2ff   :  { %4836 = vmatprep.mubr.f32.mxu0 %v6665_v0  ;;  %5221 = vmatpush3.bf16.msra.mxu0 %v6364_v13 }
 0x300   :  { %5223 = vmatprep.subr.bf16.mxu0 %v6515_v6 }
 0x302   :  { %4837 = vmatmul.mubr.f32.gmra.mrb[20].mxu0 %v6661_v24 }
 0x303   :  { %4839 = vmatprep.mubr.f32.mxu0 %v6688_v10  ;;  %5225 = vmatpush3.bf16.msra.mxu0 %v6515_v6 }
 0x304   :  { %5227 = vmatprep.subr.bf16.mxu0 %v6525_v30 }
 0x306   :  { %4840 = vmatmul.mubr.f32.gmra.mrb[22].mxu0 %v6684_v50 }
 0x307   :  { %4842 = vmatprep.mubr.f32.mxu0 %v6711_v29  ;;  %5229 = vmatpush3.bf16.msra.mxu0 %v6525_v30 }
 0x308   :  { %5231 = vmatprep.subr.bf16.mxu0 %v5230_v59 }
 0x30a   :  { %4843 = vmatmul.mubr.f32.gmra.mrb[24].mxu0 %v6706_v23 }
 0x30b   :  { %4845 = vmatprep.mubr.f32.mxu0 %v6735_v1 }
 0x30e   :  { %4846 = vmatmul.mubr.f32.gmra.mrb[26].mxu0 %v6730_v41 }
 0x30f   :  { %4848 = vmatprep.mubr.f32.mxu0 %v6759_v61 }
 0x312   :  { %4849 = vmatmul.mubr.f32.gmra.mrb[28].mxu0 %v6754_v22 }
 0x313   :  { %4851 = vmatprep.mubr.f32.mxu0 %v6782_v45 }
 0x316   :  { %4852 = vmatmul.mubr.f32.gmra.mrb[30].mxu0 %v6776_v19 }
 0x317   :  { %4870 = vmatprep.mubr.f32.mxu0 %v2674_v51  ;;  %v7151_v51 = vand.u32 4294901760, %v6730_v41 }
 0x31a   :  { %4871 = vmatmul.mubr.f32.vlgmr.msra.gmra.mrb[16].mxu0 %v7137_v49 }
 0x31b   :  { %5233 = vmatpush3.bf16.msra.mxu0 %v5230_v59  ;;  %4873 = vmatprep.mubr.f32.mxu0 %v7138_v44 }
 0x31c   :  { %5235 = vmatprep.subr.bf16.mxu0 %v5234_v46 }
 0x31e   :  { %4874 = vmatmul.mubr.f32.gmra.mrb[18].mxu0 %v7141_v7 }
 0x31f   :  { %4876 = vmatprep.mubr.f32.mxu0 %v7142_v20  ;;  %5237 = vmatpush3.bf16.msra.mxu0 %v5234_v46 }
 0x320   :  { %5239 = vmatprep.subr.bf16.mxu0 %v5238_v2 }
 0x322   :  { %4877 = vmatmul.mubr.f32.gmra.mrb[20].mxu0 %v7145_v28 }
 0x323   :  { %4879 = vmatprep.mubr.f32.mxu0 %v7146_v43  ;;  %5241 = vmatpush3.bf16.msra.mxu0 %v5238_v2 }
 0x324   :  { %5243 = vmatprep.subr.bf16.mxu0 %v5242_v8 }
 0x326   :  { %4880 = vmatmul.mubr.f32.gmra.mrb[22].mxu0 %v7147_v26 }
 0x327   :  { %4882 = vmatprep.mubr.f32.mxu0 %v7148_v9  ;;  %5245 = vmatpush3.bf16.msra.mxu0 %v5242_v8 }
 0x328   :  { %5247 = vmatprep.subr.bf16.mxu0 %v6356_v21 }
 0x32a   :  { %4883 = vmatmul.mubr.f32.gmra.mrb[24].mxu0 %v7149_v39 }
 0x32b   :  { %4885 = vmatprep.mubr.f32.mxu0 %v7150_v54 }
 0x32e   :  { %4886 = vmatmul.mubr.f32.gmra.mrb[26].mxu0 %v7151_v51 }
 0x32f   :  { %4888 = vmatprep.mubr.f32.mxu0 %v2794_v12 }
 0x332   :  { %4889 = vmatmul.mubr.f32.gmra.mrb[28].mxu0 %v7152_v48 }
 0x333   :  { %4891 = vmatprep.mubr.f32.mxu0 %v2814_v62 }
 0x336   :  { %4892 = vmatmul.mubr.f32.gmra.mrb[30].mxu0 %v2824_v57 }
 0x337   :  { %4910 = vmatprep.mubr.f32.mxu0 %v6621_v15 }
 0x33a   :  { %4911 = vmatmul.mubr.f32.vlgmr.msra.gmra.mrb[16].mxu0 %v6617_v53 }
 0x33b   :  { %5249 = vmatpush3.bf16.msra.mxu0 %v6356_v21  ;;  %4913 = vmatprep.mubr.f32.mxu0 %v6636_v3  ;;  %v3803_v21 = vld [vmem:[%s7003_s6] ss:$0 sm:$0xff] }
 0x33c   :  { %5251 = vmatprep.subr.bf16.mxu0 %v6364_v13 }
 0x33e   :  { %4914 = vmatmul.mubr.f32.gmra.mrb[18].mxu0 %v6632_v40 }
 0x33f   :  { %4916 = vmatprep.mubr.f32.mxu0 %v6657_v11  ;;  %5253 = vmatpush3.bf16.msra.mxu0 %v6364_v13 }
 0x340   :  { %5255 = vmatprep.subr.bf16.mxu0 %v6515_v6 }
 0x342   :  { %4917 = vmatmul.mubr.f32.gmra.mrb[20].mxu0 %v6653_v27 }
 0x343   :  { %4919 = vmatprep.mubr.f32.mxu0 %v6679_v63  ;;  %5257 = vmatpush3.bf16.msra.mxu0 %v6515_v6 }
 0x344   :  { %5259 = vmatprep.subr.bf16.mxu0 %v6525_v30 }
 0x346   :  { %4920 = vmatmul.mubr.f32.gmra.mrb[22].mxu0 %v6672_v36 }
 0x347   :  { %4922 = vmatprep.mubr.f32.mxu0 %v6702_v37  ;;  %5261 = vmatpush3.bf16.msra.mxu0 %v6525_v30 }
 0x34a   :  { %4923 = vmatmul.mubr.f32.gmra.mrb[24].mxu0 %v6695_v5 }
 0x34b   :  { %4925 = vmatprep.mubr.f32.mxu0 %v6725_v32 }
 0x34e   :  { %4926 = vmatmul.mubr.f32.gmra.mrb[26].mxu0 %v6718_v33 }
 0x34f   :  { %4928 = vmatprep.mubr.f32.mxu0 %v6749_v52 }
 0x352   :  { %4929 = vmatmul.mubr.f32.gmra.mrb[28].mxu0 %v6742_v16 }
 0x353   :  { %4931 = vmatprep.mubr.f32.mxu0 %v6772_v42 }
 0x356   :  { %4932 = vmatmul.mubr.f32.gmra.mrb[30].mxu0 %v6765_v31 }
 0x357   :  { %4950 = vmatprep.mubr.f32.mxu0 %v6621_v15 }
 0x35a   :  { %4951 = vmatmul.mubr.f32.vlgmr.msra.gmra.mrb[16].mxu0 %v6617_v53 }
 0x35b   :  { %4953 = vmatprep.mubr.f32.mxu0 %v6636_v3 }
 0x35e   :  { %4954 = vmatmul.mubr.f32.gmra.mrb[18].mxu0 %v6632_v40 }
 0x35f   :  { %4956 = vmatprep.mubr.f32.mxu0 %v6657_v11 }
 0x362   :  { %4957 = vmatmul.mubr.f32.gmra.mrb[20].mxu0 %v6653_v27 }
 0x363   :  { %4959 = vmatprep.mubr.f32.mxu0 %v6679_v63 }
 0x366   :  { %4960 = vmatmul.mubr.f32.gmra.mrb[22].mxu0 %v6672_v36 }
 0x367   :  { %4962 = vmatprep.mubr.f32.mxu0 %v6702_v37 }
 0x36a   :  { %4963 = vmatmul.mubr.f32.gmra.mrb[24].mxu0 %v6695_v5 }
 0x36b   :  { %4965 = vmatprep.mubr.f32.mxu0 %v6725_v32 }
 0x36e   :  { %4966 = vmatmul.mubr.f32.gmra.mrb[26].mxu0 %v6718_v33 }
 0x36f   :  { %4968 = vmatprep.mubr.f32.mxu0 %v6749_v52 }
 0x372   :  { %4969 = vmatmul.mubr.f32.gmra.mrb[28].mxu0 %v6742_v16 }
 0x373   :  { %4971 = vmatprep.mubr.f32.mxu0 %v6772_v42 }
 0x376   :  { %4972 = vmatmul.mubr.f32.gmra.mrb[30].mxu0 %v6765_v31 }
 0x42d   :  { %v4952_v13 = vpop.f32.mrb[16].mxu0 }
 0x42e   :  { %v5310_v6 = vadd.f32 %v4952_v13, %v3803_v21  ;;  %v3687_v30 = vpop.f32.mrb[17].mxu0 }
 0x42f   :  { %v5311_v53 = vadd.f32 %v3803_v21, %v3687_v30 }
 0x430   :  { %3782 = vst.msk [vmem:[%s7004_s7 + $0x8] sm:$0xff] %vm50_vm1, %v5310_v6 }
 0x431   :  { %3781 = vst.msk [vmem:[%s7004_s7] sm:$0xff] %vm50_vm1, %v5311_v53  ;;  %v4955_v15 = vpop.f32.mrb[18].mxu0 }
 0x432   :  { %v5312_v40 = vadd.f32 %v4955_v15, %v3803_v21  ;;  %v3699_v3 = vpop.f32.mrb[19].mxu0 }
 0x433   :  { %v5313_v14 = vadd.f32 %v3803_v21, %v3699_v3 }
 0x434   :  { %3784 = vst.msk [vmem:[%s7004_s7 + $0x18] sm:$0xff] %vm50_vm1, %v5312_v40 }
 0x435   :  { %3783 = vst.msk [vmem:[%s7004_s7 + $0x10] sm:$0xff] %vm50_vm1, %v5313_v14  ;;  %v4958_v27 = vpop.f32.mrb[20].mxu0 }
 0x436   :  { %v5314_v11 = vadd.f32 %v4958_v27, %v3803_v21  ;;  %v3711_v24 = vpop.f32.mrb[21].mxu0 }
 0x437   :  { %v5315_v0 = vadd.f32 %v3803_v21, %v3711_v24 }
 0x438   :  { %3786 = vst.msk [vmem:[%s7004_s7 + $0x28] sm:$0xff] %vm50_vm1, %v5314_v11 }
 0x439   :  { %3785 = vst.msk [vmem:[%s7004_s7 + $0x20] sm:$0xff] %vm50_vm1, %v5315_v0  ;;  %v4961_v36 = vpop.f32.mrb[22].mxu0 }
 0x43a   :  { %v5316_v63 = vadd.f32 %v4961_v36, %v3803_v21  ;;  %v3723_v50 = vpop.f32.mrb[23].mxu0 }
 0x43b   :  { %v5317_v10 = vadd.f32 %v3803_v21, %v3723_v50 }
 0x43c   :  { %3788 = vst.msk [vmem:[%s7004_s7 + $0x38] sm:$0xff] %vm50_vm1, %v5316_v63 }
 0x43d   :  { %3787 = vst.msk [vmem:[%s7004_s7 + $0x30] sm:$0xff] %vm50_vm1, %v5317_v10  ;;  %v4964_v5 = vpop.f32.mrb[24].mxu0 }
 0x43e   :  { %v5318_v37 = vadd.f32 %v4964_v5, %v3803_v21  ;;  %v3735_v41 = vpop.f32.mrb[25].mxu0 }
 0x43f   :  { %v5319_v23 = vadd.f32 %v3803_v21, %v3735_v41 }
 0x440   :  { %3790 = vst.msk [vmem:[%s7004_s7 + $0x48] sm:$0xff] %vm50_vm1, %v5318_v37 }
 0x441   :  { %3789 = vst.msk [vmem:[%s7004_s7 + $0x40] sm:$0xff] %vm50_vm1, %v5319_v23  ;;  %v4967_v29 = vpop.f32.mrb[26].mxu0 }
 0x442   :  { %v5320_v33 = vadd.f32 %v4967_v29, %v3803_v21  ;;  %v3747_v32 = vpop.f32.mrb[27].mxu0 }
 0x443   :  { %v5321_v22 = vadd.f32 %v3803_v21, %v3747_v32 }
 0x444   :  { %3792 = vst.msk [vmem:[%s7004_s7 + $0x58] sm:$0xff] %vm50_vm1, %v5320_v33 }
 0x445   :  { %3791 = vst.msk [vmem:[%s7004_s7 + $0x50] sm:$0xff] %vm50_vm1, %v5321_v22  ;;  %v4970_v35 = vpop.f32.mrb[28].mxu0 }
 0x446   :  { %v5322_v1 = vadd.f32 %v4970_v35, %v3803_v21  ;;  %v3759_v16 = vpop.f32.mrb[29].mxu0 }
 0x447   :  { %v5323_v52 = vadd.f32 %v3803_v21, %v3759_v16 }
 0x448   :  { %3794 = vst.msk [vmem:[%s7004_s7 + $0x68] sm:$0xff] %vm50_vm1, %v5322_v1 }
 0x449   :  { %3793 = vst.msk [vmem:[%s7004_s7 + $0x60] sm:$0xff] %vm50_vm1, %v5323_v52  ;;  %v4973_v56 = vpop.f32.mrb[30].mxu0 }
 0x44a   :  { %v5324_v61 = vadd.f32 %v4973_v56, %v3803_v21  ;;  %v3771_v31 = vpop.f32.mrb[31].mxu0 }
 0x44b   :  { %v5325_v25 = vadd.f32 %v3803_v21, %v3771_v31 }
 0x44c   :  { %3796 = vst.msk [vmem:[%s7004_s7 + $0x78] sm:$0xff] %vm50_vm1, %v5324_v61 }
 0x44d   :  { %3795 = vst.msk [vmem:[%s7004_s7 + $0x70] sm:$0xff] %vm50_vm1, %v5325_v25 }

</bundles_post_ra>
